<compile_context>
chip_gen: v7x
topology: tpu7x:2x2x1
jax: 0.10.0
libtpu: 0.0.40
codegen_flags: <defaults>
</compile_context>

<pallas_src>
import math

import jax
import jax.numpy as jnp
from jax.experimental import pallas as pl
from jax.experimental.pallas import tpu as pltpu

INPUT_SIZE = 1
HIDDEN_SIZE = 50
OUTPUT_SIZE = 1
NUM_LAYERS = 1  # single layer, matching num_layers=1

_LANE = 128


def _round_up(n, m):
    return ((n + m - 1) // m) * m


def _lstm_kernel(x_ref, wih_ref, whh_ref, b_ref, wfc_ref, bfc_ref, out_ref):
    # x_ref   : (T, B, I)
    # wih_ref : (I, 4*Hp)   per-gate zero-padded, PyTorch gate order (i, f, g, o)
    # whh_ref : (Hp, 4*Hp)  per-gate zero-padded (rows and columns)
    # b_ref   : (1, 4*Hp)   b_ih + b_hh, per-gate zero-padded
    # wfc_ref : (O, Hp)     fc weight, zero-padded columns
    # bfc_ref : (1, O)
    # out_ref : (B, O)
    T, B, I = x_ref.shape
    Hp = whh_ref.shape[0]
    O = out_ref.shape[1]

    # Weights / bias loaded once, held in vregs/VMEM across the unrolled loop.
    wih = wih_ref[...]
    whh = whh_ref[...]
    bias = b_ref[...]

    h = jnp.zeros((B, Hp), jnp.float32)
    c = jnp.zeros((B, Hp), jnp.float32)

    # Statically unrolled recurrence (T known at trace time, small).
    for t in range(T):
        x_t = x_ref[t]  # (B, I)
        if I == 1:
            # Input projection is an exact broadcast multiply when I == 1 (VPU).
            gx = x_t * wih + bias                       # (B,1)*(1,4Hp) -> (B,4Hp)
        else:
            gx = jnp.dot(x_t, wih,
                         preferred_element_type=jnp.float32) + bias
        # Single recurrent matmul per step; W_hh stays resident.
        gates = gx + jnp.dot(h, whh, preferred_element_type=jnp.float32)

        # Lane-aligned per-gate slices (Hp is a multiple of 128).
        i_g = jax.nn.sigmoid(gates[:, 0 * Hp:1 * Hp])
        f_g = jax.nn.sigmoid(gates[:, 1 * Hp:2 * Hp])
        g_g = jnp.tanh(gates[:, 2 * Hp:3 * Hp])
        o_g = jax.nn.sigmoid(gates[:, 3 * Hp:4 * Hp])

        c = f_g * c + i_g * g_g
        h = o_g * jnp.tanh(c)

    # Final Linear on the last hidden state.
    if O == 1:
        # O == 1: VPU multiply + cross-lane (XLU) reduction, no N=1 matmul.
        out_ref[...] = (
            jnp.sum(h * wfc_ref[...], axis=-1, keepdims=True) + bfc_ref[...]
        )
    else:
        # General case (not hit for this module's OUTPUT_SIZE == 1).
        out_ref[...] = (
            jnp.dot(h, jnp.transpose(wfc_ref[...], (1, 0)),
                    preferred_element_type=jnp.float32) + bfc_ref[...]
        )


def lstm_forward(x, params):
    """x: (B, T, I) float32. Returns (B, OUTPUT_SIZE)."""
    B, T, I = x.shape
    H, O = HIDDEN_SIZE, OUTPUT_SIZE
    Hp = _round_up(H, _LANE)

    # ---- one-time layout glue (zero-padded, per-gate lane-aligned) ----
    x_t = jnp.transpose(x, (1, 0, 2)).astype(jnp.float32)        # (T, B, I)

    w_ih = params["w_ih"]                                        # (4H, I)
    w_hh = params["w_hh"]                                        # (4H, H)
    b = (params["b_ih"] + params["b_hh"]).reshape(1, 4 * H)      # (1, 4H)

    def pad_gate_cols(w_t):
        # w_t: (rows, 4H) -> (rows, 4*Hp), each gate block padded to Hp lanes.
        rows = w_t.shape[0]
        out = jnp.zeros((rows, 4 * Hp), jnp.float32)
        for g in range(4):
            out = out.at[:, g * Hp:g * Hp + H].set(w_t[:, g * H:(g + 1) * H])
        return out

    wih_p = pad_gate_cols(jnp.transpose(w_ih, (1, 0)))           # (I, 4Hp)
    whh_cols = pad_gate_cols(jnp.transpose(w_hh, (1, 0)))        # (H, 4Hp)
    whh_p = jnp.zeros((Hp, 4 * Hp), jnp.float32).at[:H, :].set(whh_cols)
    b_p = pad_gate_cols(b)                                       # (1, 4Hp)

    wfc_p = jnp.zeros((O, Hp), jnp.float32).at[:, :H].set(
        params["w_fc"].reshape(O, H))                            # (O, Hp)
    bfc = params["b_fc"].reshape(1, O).astype(jnp.float32)       # (1, O)

    vmem = pl.BlockSpec(memory_space=pltpu.MemorySpace.VMEM)
    out = pl.pallas_call(
        _lstm_kernel,
        out_shape=jax.ShapeDtypeStruct((B, O), jnp.float32),
        in_specs=[vmem] * 6,
        out_specs=vmem,
    )(x_t, wih_p, whh_p, b_p, wfc_p, bfc)
    return out


def _lstm_reference(x, params):
    """Pure-JAX reference matching PyTorch nn.LSTM(batch_first) + Linear."""
    B, T, I = x.shape
    H, O = HIDDEN_SIZE, OUTPUT_SIZE
    w_ih_t = params["w_ih"].T
    w_hh_t = params["w_hh"].T
    b = (params["b_ih"] + params["b_hh"]).reshape(1, 4 * H)
    h = jnp.zeros((B, H), jnp.float32)
    c = jnp.zeros((B, H), jnp.float32)
    for t in range(T):
        gates = x[:, t, :] @ w_ih_t + h @ w_hh_t + b
        i = jax.nn.sigmoid(gates[:, 0 * H:1 * H])
        f = jax.nn.sigmoid(gates[:, 1 * H:2 * H])
        g = jnp.tanh(gates[:, 2 * H:3 * H])
        o = jax.nn.sigmoid(gates[:, 3 * H:4 * H])
        c = f * c + i * g
        h = o * jnp.tanh(c)
    return h @ params["w_fc"].T + params["b_fc"].reshape(1, O)


def init_params(key):
    """Deterministic init matching PyTorch's nn.LSTM / nn.Linear shapes."""
    H, I, O = HIDDEN_SIZE, INPUT_SIZE, OUTPUT_SIZE
    k = 1.0 / math.sqrt(H)
    keys = jax.random.split(key, 6)
    u = lambda kk, shape: jax.random.uniform(kk, shape, jnp.float32, -k, k)
    return {
        "w_ih": u(keys[0], (4 * H, I)),
        "w_hh": u(keys[1], (4 * H, H)),
        "b_ih": u(keys[2], (4 * H,)),
        "b_hh": u(keys[3], (4 * H,)),
        "w_fc": u(keys[4], (O, H)),
        "b_fc": u(keys[5], (O,)),
    }


if __name__ == "__main__":
    key = jax.random.PRNGKey(0)
    pkey, xkey = jax.random.split(key)
    params = init_params(pkey)

    B, T = 2, 8
    x = jax.random.normal(xkey, (B, T, INPUT_SIZE), dtype=jnp.float32)

    out = lstm_forward(x, params)
    jax.block_until_ready(out)
    assert out.shape == (B, OUTPUT_SIZE), out.shape

    ref = _lstm_reference(x, params)
    assert jnp.allclose(out, ref, atol=1e-4, rtol=1e-4), (out, ref)

    print("KERNEL_OK")
</pallas_src>

<mosaic_0001>
module attributes {stable_mosaic.version = 11 : i64} {
  func.func @_lstm_kernel(%arg0: memref<8x2x1xf32, #tpu.memory_space<vmem>>, %arg1: memref<1x512xf32, #tpu.memory_space<vmem>>, %arg2: memref<128x512xf32, #tpu.memory_space<vmem>>, %arg3: memref<1x512xf32, #tpu.memory_space<vmem>>, %arg4: memref<1x128xf32, #tpu.memory_space<vmem>>, %arg5: memref<1x1xf32, #tpu.memory_space<vmem>>, %arg6: memref<2x1xf32, #tpu.memory_space<vmem>>) attributes {dimension_semantics = [], scalar_prefetch = 0 : i64, scratch_operands = 0 : i64, tpu.core_type = #tpu.core_type<tc>} {
    %c0 = arith.constant 0 : index
    %c0_0 = arith.constant 0 : index
    %0 = vector.load %arg1[%c0, %c0_0] : memref<1x512xf32, #tpu.memory_space<vmem>>, vector<1x512xf32>
    %c0_1 = arith.constant 0 : index
    %c0_2 = arith.constant 0 : index
    %1 = vector.load %arg2[%c0_1, %c0_2] : memref<128x512xf32, #tpu.memory_space<vmem>>, vector<128x512xf32>
    %c0_3 = arith.constant 0 : index
    %c0_4 = arith.constant 0 : index
    %2 = vector.load %arg3[%c0_3, %c0_4] : memref<1x512xf32, #tpu.memory_space<vmem>>, vector<1x512xf32>
    %cst = arith.constant 0.000000e+00 : f32
    %3 = vector.broadcast %cst : f32 to vector<2x128xf32>
    %cst_5 = arith.constant 0.000000e+00 : f32
    %4 = vector.broadcast %cst_5 : f32 to vector<2x128xf32>
    %c0_6 = arith.constant 0 : index
    %c0_7 = arith.constant 0 : index
    %c0_8 = arith.constant 0 : index
    %5 = vector.load %arg0[%c0_6, %c0_7, %c0_8] : memref<8x2x1xf32, #tpu.memory_space<vmem>>, vector<1x2x1xf32>
    %6 = vector.shape_cast %5 : vector<1x2x1xf32> to vector<2x1xf32>
    %7 = vector.broadcast %6 : vector<2x1xf32> to vector<2x512xf32>
    %8 = vector.broadcast %0 : vector<1x512xf32> to vector<2x512xf32>
    %9 = arith.mulf %7, %8 : vector<2x512xf32>
    %10 = vector.broadcast %2 : vector<1x512xf32> to vector<2x512xf32>
    %11 = arith.addf %9, %10 : vector<2x512xf32>
    %cst_9 = arith.constant dense<0.000000e+00> : vector<2x512xf32>
    %12 = tpu.matmul %3, %1, %cst_9 {dimension_numbers = #tpu.dot_dimension_numbers<[1], [0], [0], [1], [0, 0, 1, 1], [], []>} : vector<2x128xf32>, vector<128x512xf32>, vector<2x512xf32> -> vector<2x512xf32>
    %13 = arith.addf %11, %12 : vector<2x512xf32>
    %14 = vector.extract_strided_slice %13 {offsets = [0, 0], sizes = [2, 128], strides = [1, 1]} : vector<2x512xf32> to vector<2x128xf32>
    %15 = arith.negf %14 : vector<2x128xf32>
    %16 = math.exp %15 : vector<2x128xf32>
    %cst_10 = arith.constant 1.000000e+00 : f32
    %17 = vector.broadcast %cst_10 : f32 to vector<2x128xf32>
    %18 = arith.addf %17, %16 : vector<2x128xf32>
    %19 = arith.divf %17, %18 : vector<2x128xf32>
    %20 = vector.extract_strided_slice %13 {offsets = [0, 128], sizes = [2, 128], strides = [1, 1]} : vector<2x512xf32> to vector<2x128xf32>
    %21 = arith.negf %20 : vector<2x128xf32>
    %22 = math.exp %21 : vector<2x128xf32>
    %cst_11 = arith.constant 1.000000e+00 : f32
    %23 = vector.broadcast %cst_11 : f32 to vector<2x128xf32>
    %24 = arith.addf %23, %22 : vector<2x128xf32>
    %25 = arith.divf %23, %24 : vector<2x128xf32>
    %26 = vector.extract_strided_slice %13 {offsets = [0, 256], sizes = [2, 128], strides = [1, 1]} : vector<2x512xf32> to vector<2x128xf32>
    %27 = math.tanh %26 : vector<2x128xf32>
    %28 = vector.extract_strided_slice %13 {offsets = [0, 384], sizes = [2, 128], strides = [1, 1]} : vector<2x512xf32> to vector<2x128xf32>
    %29 = arith.negf %28 : vector<2x128xf32>
    %30 = math.exp %29 : vector<2x128xf32>
    %cst_12 = arith.constant 1.000000e+00 : f32
    %31 = vector.broadcast %cst_12 : f32 to vector<2x128xf32>
    %32 = arith.addf %31, %30 : vector<2x128xf32>
    %33 = arith.divf %31, %32 : vector<2x128xf32>
    %34 = arith.mulf %25, %4 : vector<2x128xf32>
    %35 = arith.mulf %19, %27 : vector<2x128xf32>
    %36 = arith.addf %34, %35 : vector<2x128xf32>
    %37 = math.tanh %36 : vector<2x128xf32>
    %38 = arith.mulf %33, %37 : vector<2x128xf32>
    %c1 = arith.constant 1 : index
    %c0_13 = arith.constant 0 : index
    %c0_14 = arith.constant 0 : index
    %39 = vector.load %arg0[%c1, %c0_13, %c0_14] : memref<8x2x1xf32, #tpu.memory_space<vmem>>, vector<1x2x1xf32>
    %40 = vector.shape_cast %39 : vector<1x2x1xf32> to vector<2x1xf32>
    %41 = vector.broadcast %40 : vector<2x1xf32> to vector<2x512xf32>
    %42 = vector.broadcast %0 : vector<1x512xf32> to vector<2x512xf32>
    %43 = arith.mulf %41, %42 : vector<2x512xf32>
    %44 = vector.broadcast %2 : vector<1x512xf32> to vector<2x512xf32>
    %45 = arith.addf %43, %44 : vector<2x512xf32>
    %cst_15 = arith.constant dense<0.000000e+00> : vector<2x512xf32>
    %46 = tpu.matmul %38, %1, %cst_15 {dimension_numbers = #tpu.dot_dimension_numbers<[1], [0], [0], [1], [0, 0, 1, 1], [], []>} : vector<2x128xf32>, vector<128x512xf32>, vector<2x512xf32> -> vector<2x512xf32>
    %47 = arith.addf %45, %46 : vector<2x512xf32>
    %48 = vector.extract_strided_slice %47 {offsets = [0, 0], sizes = [2, 128], strides = [1, 1]} : vector<2x512xf32> to vector<2x128xf32>
    %49 = arith.negf %48 : vector<2x128xf32>
    %50 = math.exp %49 : vector<2x128xf32>
    %cst_16 = arith.constant 1.000000e+00 : f32
    %51 = vector.broadcast %cst_16 : f32 to vector<2x128xf32>
    %52 = arith.addf %51, %50 : vector<2x128xf32>
    %53 = arith.divf %51, %52 : vector<2x128xf32>
    %54 = vector.extract_strided_slice %47 {offsets = [0, 128], sizes = [2, 128], strides = [1, 1]} : vector<2x512xf32> to vector<2x128xf32>
    %55 = arith.negf %54 : vector<2x128xf32>
    %56 = math.exp %55 : vector<2x128xf32>
    %cst_17 = arith.constant 1.000000e+00 : f32
    %57 = vector.broadcast %cst_17 : f32 to vector<2x128xf32>
    %58 = arith.addf %57, %56 : vector<2x128xf32>
    %59 = arith.divf %57, %58 : vector<2x128xf32>
    %60 = vector.extract_strided_slice %47 {offsets = [0, 256], sizes = [2, 128], strides = [1, 1]} : vector<2x512xf32> to vector<2x128xf32>
    %61 = math.tanh %60 : vector<2x128xf32>
    %62 = vector.extract_strided_slice %47 {offsets = [0, 384], sizes = [2, 128], strides = [1, 1]} : vector<2x512xf32> to vector<2x128xf32>
    %63 = arith.negf %62 : vector<2x128xf32>
    %64 = math.exp %63 : vector<2x128xf32>
    %cst_18 = arith.constant 1.000000e+00 : f32
    %65 = vector.broadcast %cst_18 : f32 to vector<2x128xf32>
    %66 = arith.addf %65, %64 : vector<2x128xf32>
    %67 = arith.divf %65, %66 : vector<2x128xf32>
    %68 = arith.mulf %59, %36 : vector<2x128xf32>
    %69 = arith.mulf %53, %61 : vector<2x128xf32>
    %70 = arith.addf %68, %69 : vector<2x128xf32>
    %71 = math.tanh %70 : vector<2x128xf32>
    %72 = arith.mulf %67, %71 : vector<2x128xf32>
    %c2 = arith.constant 2 : index
    %c0_19 = arith.constant 0 : index
    %c0_20 = arith.constant 0 : index
    %73 = vector.load %arg0[%c2, %c0_19, %c0_20] : memref<8x2x1xf32, #tpu.memory_space<vmem>>, vector<1x2x1xf32>
    %74 = vector.shape_cast %73 : vector<1x2x1xf32> to vector<2x1xf32>
    %75 = vector.broadcast %74 : vector<2x1xf32> to vector<2x512xf32>
    %76 = vector.broadcast %0 : vector<1x512xf32> to vector<2x512xf32>
    %77 = arith.mulf %75, %76 : vector<2x512xf32>
    %78 = vector.broadcast %2 : vector<1x512xf32> to vector<2x512xf32>
    %79 = arith.addf %77, %78 : vector<2x512xf32>
    %cst_21 = arith.constant dense<0.000000e+00> : vector<2x512xf32>
    %80 = tpu.matmul %72, %1, %cst_21 {dimension_numbers = #tpu.dot_dimension_numbers<[1], [0], [0], [1], [0, 0, 1, 1], [], []>} : vector<2x128xf32>, vector<128x512xf32>, vector<2x512xf32> -> vector<2x512xf32>
    %81 = arith.addf %79, %80 : vector<2x512xf32>
    %82 = vector.extract_strided_slice %81 {offsets = [0, 0], sizes = [2, 128], strides = [1, 1]} : vector<2x512xf32> to vector<2x128xf32>
    %83 = arith.negf %82 : vector<2x128xf32>
    %84 = math.exp %83 : vector<2x128xf32>
    %cst_22 = arith.constant 1.000000e+00 : f32
    %85 = vector.broadcast %cst_22 : f32 to vector<2x128xf32>
    %86 = arith.addf %85, %84 : vector<2x128xf32>
    %87 = arith.divf %85, %86 : vector<2x128xf32>
    %88 = vector.extract_strided_slice %81 {offsets = [0, 128], sizes = [2, 128], strides = [1, 1]} : vector<2x512xf32> to vector<2x128xf32>
    %89 = arith.negf %88 : vector<2x128xf32>
    %90 = math.exp %89 : vector<2x128xf32>
    %cst_23 = arith.constant 1.000000e+00 : f32
    %91 = vector.broadcast %cst_23 : f32 to vector<2x128xf32>
    %92 = arith.addf %91, %90 : vector<2x128xf32>
    %93 = arith.divf %91, %92 : vector<2x128xf32>
    %94 = vector.extract_strided_slice %81 {offsets = [0, 256], sizes = [2, 128], strides = [1, 1]} : vector<2x512xf32> to vector<2x128xf32>
    %95 = math.tanh %94 : vector<2x128xf32>
    %96 = vector.extract_strided_slice %81 {offsets = [0, 384], sizes = [2, 128], strides = [1, 1]} : vector<2x512xf32> to vector<2x128xf32>
    %97 = arith.negf %96 : vector<2x128xf32>
    %98 = math.exp %97 : vector<2x128xf32>
    %cst_24 = arith.constant 1.000000e+00 : f32
    %99 = vector.broadcast %cst_24 : f32 to vector<2x128xf32>
    %100 = arith.addf %99, %98 : vector<2x128xf32>
    %101 = arith.divf %99, %100 : vector<2x128xf32>
    %102 = arith.mulf %93, %70 : vector<2x128xf32>
    %103 = arith.mulf %87, %95 : vector<2x128xf32>
    %104 = arith.addf %102, %103 : vector<2x128xf32>
    %105 = math.tanh %104 : vector<2x128xf32>
    %106 = arith.mulf %101, %105 : vector<2x128xf32>
    %c3 = arith.constant 3 : index
    %c0_25 = arith.constant 0 : index
    %c0_26 = arith.constant 0 : index
    %107 = vector.load %arg0[%c3, %c0_25, %c0_26] : memref<8x2x1xf32, #tpu.memory_space<vmem>>, vector<1x2x1xf32>
    %108 = vector.shape_cast %107 : vector<1x2x1xf32> to vector<2x1xf32>
    %109 = vector.broadcast %108 : vector<2x1xf32> to vector<2x512xf32>
    %110 = vector.broadcast %0 : vector<1x512xf32> to vector<2x512xf32>
    %111 = arith.mulf %109, %110 : vector<2x512xf32>
    %112 = vector.broadcast %2 : vector<1x512xf32> to vector<2x512xf32>
    %113 = arith.addf %111, %112 : vector<2x512xf32>
    %cst_27 = arith.constant dense<0.000000e+00> : vector<2x512xf32>
    %114 = tpu.matmul %106, %1, %cst_27 {dimension_numbers = #tpu.dot_dimension_numbers<[1], [0], [0], [1], [0, 0, 1, 1], [], []>} : vector<2x128xf32>, vector<128x512xf32>, vector<2x512xf32> -> vector<2x512xf32>
    %115 = arith.addf %113, %114 : vector<2x512xf32>
    %116 = vector.extract_strided_slice %115 {offsets = [0, 0], sizes = [2, 128], strides = [1, 1]} : vector<2x512xf32> to vector<2x128xf32>
    %117 = arith.negf %116 : vector<2x128xf32>
    %118 = math.exp %117 : vector<2x128xf32>
    %cst_28 = arith.constant 1.000000e+00 : f32
    %119 = vector.broadcast %cst_28 : f32 to vector<2x128xf32>
    %120 = arith.addf %119, %118 : vector<2x128xf32>
    %121 = arith.divf %119, %120 : vector<2x128xf32>
    %122 = vector.extract_strided_slice %115 {offsets = [0, 128], sizes = [2, 128], strides = [1, 1]} : vector<2x512xf32> to vector<2x128xf32>
    %123 = arith.negf %122 : vector<2x128xf32>
    %124 = math.exp %123 : vector<2x128xf32>
    %cst_29 = arith.constant 1.000000e+00 : f32
    %125 = vector.broadcast %cst_29 : f32 to vector<2x128xf32>
    %126 = arith.addf %125, %124 : vector<2x128xf32>
    %127 = arith.divf %125, %126 : vector<2x128xf32>
    %128 = vector.extract_strided_slice %115 {offsets = [0, 256], sizes = [2, 128], strides = [1, 1]} : vector<2x512xf32> to vector<2x128xf32>
    %129 = math.tanh %128 : vector<2x128xf32>
    %130 = vector.extract_strided_slice %115 {offsets = [0, 384], sizes = [2, 128], strides = [1, 1]} : vector<2x512xf32> to vector<2x128xf32>
    %131 = arith.negf %130 : vector<2x128xf32>
    %132 = math.exp %131 : vector<2x128xf32>
    %cst_30 = arith.constant 1.000000e+00 : f32
    %133 = vector.broadcast %cst_30 : f32 to vector<2x128xf32>
    %134 = arith.addf %133, %132 : vector<2x128xf32>
    %135 = arith.divf %133, %134 : vector<2x128xf32>
    %136 = arith.mulf %127, %104 : vector<2x128xf32>
    %137 = arith.mulf %121, %129 : vector<2x128xf32>
    %138 = arith.addf %136, %137 : vector<2x128xf32>
    %139 = math.tanh %138 : vector<2x128xf32>
    %140 = arith.mulf %135, %139 : vector<2x128xf32>
    %c4 = arith.constant 4 : index
    %c0_31 = arith.constant 0 : index
    %c0_32 = arith.constant 0 : index
    %141 = vector.load %arg0[%c4, %c0_31, %c0_32] : memref<8x2x1xf32, #tpu.memory_space<vmem>>, vector<1x2x1xf32>
    %142 = vector.shape_cast %141 : vector<1x2x1xf32> to vector<2x1xf32>
    %143 = vector.broadcast %142 : vector<2x1xf32> to vector<2x512xf32>
    %144 = vector.broadcast %0 : vector<1x512xf32> to vector<2x512xf32>
    %145 = arith.mulf %143, %144 : vector<2x512xf32>
    %146 = vector.broadcast %2 : vector<1x512xf32> to vector<2x512xf32>
    %147 = arith.addf %145, %146 : vector<2x512xf32>
    %cst_33 = arith.constant dense<0.000000e+00> : vector<2x512xf32>
    %148 = tpu.matmul %140, %1, %cst_33 {dimension_numbers = #tpu.dot_dimension_numbers<[1], [0], [0], [1], [0, 0, 1, 1], [], []>} : vector<2x128xf32>, vector<128x512xf32>, vector<2x512xf32> -> vector<2x512xf32>
    %149 = arith.addf %147, %148 : vector<2x512xf32>
    %150 = vector.extract_strided_slice %149 {offsets = [0, 0], sizes = [2, 128], strides = [1, 1]} : vector<2x512xf32> to vector<2x128xf32>
    %151 = arith.negf %150 : vector<2x128xf32>
    %152 = math.exp %151 : vector<2x128xf32>
    %cst_34 = arith.constant 1.000000e+00 : f32
    %153 = vector.broadcast %cst_34 : f32 to vector<2x128xf32>
    %154 = arith.addf %153, %152 : vector<2x128xf32>
    %155 = arith.divf %153, %154 : vector<2x128xf32>
    %156 = vector.extract_strided_slice %149 {offsets = [0, 128], sizes = [2, 128], strides = [1, 1]} : vector<2x512xf32> to vector<2x128xf32>
    %157 = arith.negf %156 : vector<2x128xf32>
    %158 = math.exp %157 : vector<2x128xf32>
    %cst_35 = arith.constant 1.000000e+00 : f32
    %159 = vector.broadcast %cst_35 : f32 to vector<2x128xf32>
    %160 = arith.addf %159, %158 : vector<2x128xf32>
    %161 = arith.divf %159, %160 : vector<2x128xf32>
    %162 = vector.extract_strided_slice %149 {offsets = [0, 256], sizes = [2, 128], strides = [1, 1]} : vector<2x512xf32> to vector<2x128xf32>
    %163 = math.tanh %162 : vector<2x128xf32>
    %164 = vector.extract_strided_slice %149 {offsets = [0, 384], sizes = [2, 128], strides = [1, 1]} : vector<2x512xf32> to vector<2x128xf32>
    %165 = arith.negf %164 : vector<2x128xf32>
    %166 = math.exp %165 : vector<2x128xf32>
    %cst_36 = arith.constant 1.000000e+00 : f32
    %167 = vector.broadcast %cst_36 : f32 to vector<2x128xf32>
    %168 = arith.addf %167, %166 : vector<2x128xf32>
    %169 = arith.divf %167, %168 : vector<2x128xf32>
    %170 = arith.mulf %161, %138 : vector<2x128xf32>
    %171 = arith.mulf %155, %163 : vector<2x128xf32>
    %172 = arith.addf %170, %171 : vector<2x128xf32>
    %173 = math.tanh %172 : vector<2x128xf32>
    %174 = arith.mulf %169, %173 : vector<2x128xf32>
    %c5 = arith.constant 5 : index
    %c0_37 = arith.constant 0 : index
    %c0_38 = arith.constant 0 : index
    %175 = vector.load %arg0[%c5, %c0_37, %c0_38] : memref<8x2x1xf32, #tpu.memory_space<vmem>>, vector<1x2x1xf32>
    %176 = vector.shape_cast %175 : vector<1x2x1xf32> to vector<2x1xf32>
    %177 = vector.broadcast %176 : vector<2x1xf32> to vector<2x512xf32>
    %178 = vector.broadcast %0 : vector<1x512xf32> to vector<2x512xf32>
    %179 = arith.mulf %177, %178 : vector<2x512xf32>
    %180 = vector.broadcast %2 : vector<1x512xf32> to vector<2x512xf32>
    %181 = arith.addf %179, %180 : vector<2x512xf32>
    %cst_39 = arith.constant dense<0.000000e+00> : vector<2x512xf32>
    %182 = tpu.matmul %174, %1, %cst_39 {dimension_numbers = #tpu.dot_dimension_numbers<[1], [0], [0], [1], [0, 0, 1, 1], [], []>} : vector<2x128xf32>, vector<128x512xf32>, vector<2x512xf32> -> vector<2x512xf32>
    %183 = arith.addf %181, %182 : vector<2x512xf32>
    %184 = vector.extract_strided_slice %183 {offsets = [0, 0], sizes = [2, 128], strides = [1, 1]} : vector<2x512xf32> to vector<2x128xf32>
    %185 = arith.negf %184 : vector<2x128xf32>
    %186 = math.exp %185 : vector<2x128xf32>
    %cst_40 = arith.constant 1.000000e+00 : f32
    %187 = vector.broadcast %cst_40 : f32 to vector<2x128xf32>
    %188 = arith.addf %187, %186 : vector<2x128xf32>
    %189 = arith.divf %187, %188 : vector<2x128xf32>
    %190 = vector.extract_strided_slice %183 {offsets = [0, 128], sizes = [2, 128], strides = [1, 1]} : vector<2x512xf32> to vector<2x128xf32>
    %191 = arith.negf %190 : vector<2x128xf32>
    %192 = math.exp %191 : vector<2x128xf32>
    %cst_41 = arith.constant 1.000000e+00 : f32
    %193 = vector.broadcast %cst_41 : f32 to vector<2x128xf32>
    %194 = arith.addf %193, %192 : vector<2x128xf32>
    %195 = arith.divf %193, %194 : vector<2x128xf32>
    %196 = vector.extract_strided_slice %183 {offsets = [0, 256], sizes = [2, 128], strides = [1, 1]} : vector<2x512xf32> to vector<2x128xf32>
    %197 = math.tanh %196 : vector<2x128xf32>
    %198 = vector.extract_strided_slice %183 {offsets = [0, 384], sizes = [2, 128], strides = [1, 1]} : vector<2x512xf32> to vector<2x128xf32>
    %199 = arith.negf %198 : vector<2x128xf32>
    %200 = math.exp %199 : vector<2x128xf32>
    %cst_42 = arith.constant 1.000000e+00 : f32
    %201 = vector.broadcast %cst_42 : f32 to vector<2x128xf32>
    %202 = arith.addf %201, %200 : vector<2x128xf32>
    %203 = arith.divf %201, %202 : vector<2x128xf32>
    %204 = arith.mulf %195, %172 : vector<2x128xf32>
    %205 = arith.mulf %189, %197 : vector<2x128xf32>
    %206 = arith.addf %204, %205 : vector<2x128xf32>
    %207 = math.tanh %206 : vector<2x128xf32>
    %208 = arith.mulf %203, %207 : vector<2x128xf32>
    %c6 = arith.constant 6 : index
    %c0_43 = arith.constant 0 : index
    %c0_44 = arith.constant 0 : index
    %209 = vector.load %arg0[%c6, %c0_43, %c0_44] : memref<8x2x1xf32, #tpu.memory_space<vmem>>, vector<1x2x1xf32>
    %210 = vector.shape_cast %209 : vector<1x2x1xf32> to vector<2x1xf32>
    %211 = vector.broadcast %210 : vector<2x1xf32> to vector<2x512xf32>
    %212 = vector.broadcast %0 : vector<1x512xf32> to vector<2x512xf32>
    %213 = arith.mulf %211, %212 : vector<2x512xf32>
    %214 = vector.broadcast %2 : vector<1x512xf32> to vector<2x512xf32>
    %215 = arith.addf %213, %214 : vector<2x512xf32>
    %cst_45 = arith.constant dense<0.000000e+00> : vector<2x512xf32>
    %216 = tpu.matmul %208, %1, %cst_45 {dimension_numbers = #tpu.dot_dimension_numbers<[1], [0], [0], [1], [0, 0, 1, 1], [], []>} : vector<2x128xf32>, vector<128x512xf32>, vector<2x512xf32> -> vector<2x512xf32>
    %217 = arith.addf %215, %216 : vector<2x512xf32>
    %218 = vector.extract_strided_slice %217 {offsets = [0, 0], sizes = [2, 128], strides = [1, 1]} : vector<2x512xf32> to vector<2x128xf32>
    %219 = arith.negf %218 : vector<2x128xf32>
    %220 = math.exp %219 : vector<2x128xf32>
    %cst_46 = arith.constant 1.000000e+00 : f32
    %221 = vector.broadcast %cst_46 : f32 to vector<2x128xf32>
    %222 = arith.addf %221, %220 : vector<2x128xf32>
    %223 = arith.divf %221, %222 : vector<2x128xf32>
    %224 = vector.extract_strided_slice %217 {offsets = [0, 128], sizes = [2, 128], strides = [1, 1]} : vector<2x512xf32> to vector<2x128xf32>
    %225 = arith.negf %224 : vector<2x128xf32>
    %226 = math.exp %225 : vector<2x128xf32>
    %cst_47 = arith.constant 1.000000e+00 : f32
    %227 = vector.broadcast %cst_47 : f32 to vector<2x128xf32>
    %228 = arith.addf %227, %226 : vector<2x128xf32>
    %229 = arith.divf %227, %228 : vector<2x128xf32>
    %230 = vector.extract_strided_slice %217 {offsets = [0, 256], sizes = [2, 128], strides = [1, 1]} : vector<2x512xf32> to vector<2x128xf32>
    %231 = math.tanh %230 : vector<2x128xf32>
    %232 = vector.extract_strided_slice %217 {offsets = [0, 384], sizes = [2, 128], strides = [1, 1]} : vector<2x512xf32> to vector<2x128xf32>
    %233 = arith.negf %232 : vector<2x128xf32>
    %234 = math.exp %233 : vector<2x128xf32>
    %cst_48 = arith.constant 1.000000e+00 : f32
    %235 = vector.broadcast %cst_48 : f32 to vector<2x128xf32>
    %236 = arith.addf %235, %234 : vector<2x128xf32>
    %237 = arith.divf %235, %236 : vector<2x128xf32>
    %238 = arith.mulf %229, %206 : vector<2x128xf32>
    %239 = arith.mulf %223, %231 : vector<2x128xf32>
    %240 = arith.addf %238, %239 : vector<2x128xf32>
    %241 = math.tanh %240 : vector<2x128xf32>
    %242 = arith.mulf %237, %241 : vector<2x128xf32>
    %c7 = arith.constant 7 : index
    %c0_49 = arith.constant 0 : index
    %c0_50 = arith.constant 0 : index
    %243 = vector.load %arg0[%c7, %c0_49, %c0_50] : memref<8x2x1xf32, #tpu.memory_space<vmem>>, vector<1x2x1xf32>
    %244 = vector.shape_cast %243 : vector<1x2x1xf32> to vector<2x1xf32>
    %245 = vector.broadcast %244 : vector<2x1xf32> to vector<2x512xf32>
    %246 = vector.broadcast %0 : vector<1x512xf32> to vector<2x512xf32>
    %247 = arith.mulf %245, %246 : vector<2x512xf32>
    %248 = vector.broadcast %2 : vector<1x512xf32> to vector<2x512xf32>
    %249 = arith.addf %247, %248 : vector<2x512xf32>
    %cst_51 = arith.constant dense<0.000000e+00> : vector<2x512xf32>
    %250 = tpu.matmul %242, %1, %cst_51 {dimension_numbers = #tpu.dot_dimension_numbers<[1], [0], [0], [1], [0, 0, 1, 1], [], []>} : vector<2x128xf32>, vector<128x512xf32>, vector<2x512xf32> -> vector<2x512xf32>
    %251 = arith.addf %249, %250 : vector<2x512xf32>
    %252 = vector.extract_strided_slice %251 {offsets = [0, 0], sizes = [2, 128], strides = [1, 1]} : vector<2x512xf32> to vector<2x128xf32>
    %253 = arith.negf %252 : vector<2x128xf32>
    %254 = math.exp %253 : vector<2x128xf32>
    %cst_52 = arith.constant 1.000000e+00 : f32
    %255 = vector.broadcast %cst_52 : f32 to vector<2x128xf32>
    %256 = arith.addf %255, %254 : vector<2x128xf32>
    %257 = arith.divf %255, %256 : vector<2x128xf32>
    %258 = vector.extract_strided_slice %251 {offsets = [0, 128], sizes = [2, 128], strides = [1, 1]} : vector<2x512xf32> to vector<2x128xf32>
    %259 = arith.negf %258 : vector<2x128xf32>
    %260 = math.exp %259 : vector<2x128xf32>
    %cst_53 = arith.constant 1.000000e+00 : f32
    %261 = vector.broadcast %cst_53 : f32 to vector<2x128xf32>
    %262 = arith.addf %261, %260 : vector<2x128xf32>
    %263 = arith.divf %261, %262 : vector<2x128xf32>
    %264 = vector.extract_strided_slice %251 {offsets = [0, 256], sizes = [2, 128], strides = [1, 1]} : vector<2x512xf32> to vector<2x128xf32>
    %265 = math.tanh %264 : vector<2x128xf32>
    %266 = vector.extract_strided_slice %251 {offsets = [0, 384], sizes = [2, 128], strides = [1, 1]} : vector<2x512xf32> to vector<2x128xf32>
    %267 = arith.negf %266 : vector<2x128xf32>
    %268 = math.exp %267 : vector<2x128xf32>
    %cst_54 = arith.constant 1.000000e+00 : f32
    %269 = vector.broadcast %cst_54 : f32 to vector<2x128xf32>
    %270 = arith.addf %269, %268 : vector<2x128xf32>
    %271 = arith.divf %269, %270 : vector<2x128xf32>
    %272 = arith.mulf %263, %240 : vector<2x128xf32>
    %273 = arith.mulf %257, %265 : vector<2x128xf32>
    %274 = arith.addf %272, %273 : vector<2x128xf32>
    %275 = math.tanh %274 : vector<2x128xf32>
    %276 = arith.mulf %271, %275 : vector<2x128xf32>
    %c0_55 = arith.constant 0 : index
    %c0_56 = arith.constant 0 : index
    %277 = vector.load %arg4[%c0_55, %c0_56] : memref<1x128xf32, #tpu.memory_space<vmem>>, vector<1x128xf32>
    %278 = vector.broadcast %277 : vector<1x128xf32> to vector<2x128xf32>
    %279 = arith.mulf %276, %278 : vector<2x128xf32>
    %cst_57 = arith.constant dense<0.000000e+00> : vector<2xf32>
    %280 = vector.multi_reduction <add>, %279, %cst_57 [1] : vector<2x128xf32> to vector<2xf32>
    %281 = vector.shape_cast %280 : vector<2xf32> to vector<2x1xf32>
    %c0_58 = arith.constant 0 : index
    %c0_59 = arith.constant 0 : index
    %282 = vector.load %arg5[%c0_58, %c0_59] : memref<1x1xf32, #tpu.memory_space<vmem>>, vector<1x1xf32>
    %283 = vector.broadcast %282 : vector<1x1xf32> to vector<2x1xf32>
    %284 = arith.addf %281, %283 : vector<2x1xf32>
    %c0_60 = arith.constant 0 : index
    %c0_61 = arith.constant 0 : index
    %285 = vector.load %arg6[%c0_60, %c0_61] : memref<2x1xf32, #tpu.memory_space<vmem>>, vector<2x1xf32>
    tpu.vector_store %arg6[%c0_60, %c0_61], %284 {strides = array<i32>} : memref<2x1xf32, #tpu.memory_space<vmem>>, vector<2x1xf32>,
    return
  }
}

</mosaic_0001>

<bundles_post_ra>
// kernel: tpu_custom_call.1
= control target key start
LH: loop header
LB: loop body
LE: loop exit
PB: predicated region body
PF: predicated region fallthrough
CT: control target
= control target key end

     0   :  { %s2890_s0 = inlined_call_operand.vmem [shape: f32[8,2,1], index: 0, kind: input, shape index: {}]   ;;  %s2891_s1 = inlined_call_operand.vmem [shape: f32[1,512], index: 1, kind: input, shape index: {}]   ;;  %s2892_s2 = inlined_call_operand.hbm [shape: f32[128,512], index: 2, kind: input, shape index: {}]   ;;  %s2893_s3 = inlined_call_operand.vmem [shape: f32[1,512], index: 3, kind: input, shape index: {}]   ;;  %s2894_s4 = inlined_call_operand.vmem [shape: f32[1,128], index: 4, kind: input, shape index: {}]   ;;  %s2895_s5 = inlined_call_operand.<no memory space> [shape: f32[1,1], index: 5, kind: input, shape index: {}]   ;;  %s2896_s6 = inlined_call_operand.vmem [shape: f32[2,1], index: 6, kind: output, shape index: {}]  }
   0x1   :  { %v11_v0 = vstv %s2895_s5 }
   0x2   :  { %12 = vst [vmem:[#allocation2] sm:$0x1] %v11_v0 }
   0x3   :  { %13 = vsyncpa [#allocation4], 0  ;;  %s2357_s23 = smov [#allocation3]   ;;  %s2333_s27 = scalar_lea.hbm %s2892_s2, 8192 }
   0x4   :  { %s23_s24 = sshll.u32 %s2357_s23, 4  ;;  %p2334_p0 = scmp.ne.s32.totalorder %s2892_s2, %s2333_s27  ;;  %s24_s24 = int_to_ptr.vmem [resolvable:$true] %s23_s24 }
   0x5   :  { %p2337_p1 = scmp.lt.u32.totalorder %s2333_s27, %s2892_s2 }
   0x7   :  { %p2339_p2 = pnand %p2337_p1, %p2334_p0 }
   0x9   :  { %2342 = shalt.err (!%p2339_p2)
}
   0xa   :  { %s2343_s5 = scalar_lea.vmem %s24_s24, 8192  ;;  %p2348_p4 = scmp.lt.s32.totalorder %s24_s24, %s24_s24 }
   0xb   :  { %p2344_p3 = scmp.ne.s32.totalorder %s24_s24, %s2343_s5  ;;  %p2349_p5 = scmp.lt.s32.totalorder %s2343_s5, %s2343_s5 }
   0xd   :  { %p2350_p6 = por %p2349_p5, %p2348_p4 }
   0xf   :  { %p2351_p7 = pnand %p2350_p6, %p2344_p3 }
  0x11   :  { %2354 = shalt.err (!%p2351_p7)
}
  0x12   :  { %s2358_s8 = smov 512   ;;  %s2359_s9 = smov 32  }
  0x13   :  { %29 = dma.hbm_to_vmem [thread:$0]  %s2892_s2, 8192, %s24_s24, [#allocation4], %s2358_s8, %s2358_s8, %s2359_s9  }
  0x14   :  { %2355 = dma.done.wait [#allocation4], 8192  }
  0x15   :  { %2356 = vsyncadd [#allocation4], 4294959104  ;;  %v2360_v1 = vmov 0.0   ;;  %v2361_v2 = vmov 0   ;;  %v41_v3 = vld [vmem:[#allocation3 + $0x8] sm:$0xff]  ;;  %v43_v5 = vld [vmem:[#allocation3 + $0x18] sm:$0xff] }
  0x16   :  { %225 = vmatprep.mubr.f32.mxu0 %v2360_v1  ;;  %296 = vmatprep.mubr.f32.mxu1 %v2360_v1  ;;  %v45_v4 = vld [vmem:[#allocation3 + $0x28] sm:$0xff]  ;;  %v47_v7 = vld [vmem:[#allocation3 + $0x38] sm:$0xff]  ;;  %v40_v8 = vld [vmem:[#allocation3] sm:$0xff]  ;;  %vm1634_vm0 = vcmask 1041408   ;;  %vm1646_vm1 = vcmask 1024  }
  0x17   :  { %2203 = vset.pattern.permute.xlu0 %v2361_v2  ;;  %2204 = vset.pattern.permute.xlu1 %v2361_v2  ;;  %v2414_v6 = vpack.c.bf16 %v45_v4, %v41_v3  ;;  %v44_v9 = vld [vmem:[#allocation3 + $0x20] sm:$0xff]  ;;  %v2416_v10 = vpack.c.bf16 %v47_v7, %v43_v5  ;;  %v42_v12 = vld [vmem:[#allocation3 + $0x10] sm:$0xff]  ;;  %v49_v14 = vld [vmem:[#allocation3 + $0x48] sm:$0xff] }
  0x18   :  { %v2418_v11 = vpack.c.bf16 %v44_v9, %v40_v8  ;;  %v46_v13 = vld [vmem:[#allocation3 + $0x30] sm:$0xff]  ;;  %v53_v16 = vld [vmem:[#allocation3 + $0x68] sm:$0xff]  ;;  %v51_v17 = vld [vmem:[#allocation3 + $0x58] sm:$0xff] }
  0x19   :  { %1687 = vmatprep.subr.bf16.mxu0 %v2414_v6  ;;  %v2421_v15 = vpack.c.bf16 %v46_v13, %v42_v12  ;;  %v55_v18 = vld [vmem:[#allocation3 + $0x78] sm:$0xff]  ;;  %1719 = vmatprep.subr.bf16.mxu1 %v2416_v10  ;;  %v2425_v19 = vpack.c.bf16 %v53_v16, %v49_v14  ;;  %v48_v21 = vld [vmem:[#allocation3 + $0x40] sm:$0xff]  ;;  %v50_v23 = vld [vmem:[#allocation3 + $0x50] sm:$0xff] }
  0x1a   :  { %1689 = vmatpush1.bf16.msra.mxu0 %v2418_v11  ;;  %v2427_v20 = vpack.c.bf16 %v55_v18, %v51_v17  ;;  %v52_v22 = vld [vmem:[#allocation3 + $0x60] sm:$0xff]  ;;  %v54_v25 = vld [vmem:[#allocation3 + $0x70] sm:$0xff]  ;;  %v57_v26 = vld [vmem:[#allocation3 + $0x88] sm:$0xff] }
  0x1b   :  { %1721 = vmatpush1.bf16.msra.mxu1 %v2421_v15  ;;  %v2430_v24 = vpack.c.bf16 %v52_v22, %v48_v21  ;;  %v61_v27 = vld [vmem:[#allocation3 + $0xa8] sm:$0xff]  ;;  %1691 = vmatprep.subr.bf16.mxu0 %v2425_v19  ;;  %v2434_v28 = vpack.c.bf16 %v54_v25, %v50_v23  ;;  %v59_v30 = vld [vmem:[#allocation3 + $0x98] sm:$0xff]  ;;  %v56_v32 = vld [vmem:[#allocation3 + $0x80] sm:$0xff] }
  0x1c   :  { %1723 = vmatprep.subr.bf16.mxu1 %v2427_v20  ;;  %v2436_v29 = vpack.c.bf16 %v61_v27, %v57_v26  ;;  %v63_v31 = vld [vmem:[#allocation3 + $0xb8] sm:$0xff]  ;;  %v60_v34 = vld [vmem:[#allocation3 + $0xa0] sm:$0xff]  ;;  %v58_v35 = vld [vmem:[#allocation3 + $0x90] sm:$0xff] }
  0x1d   :  { %v2438_v33 = vpack.c.bf16 %v63_v31, %v59_v30  ;;  %v62_v36 = vld [vmem:[#allocation3 + $0xb0] sm:$0xff]  ;;  %v2441_v37 = vpack.c.bf16 %v60_v34, %v56_v32  ;;  %v65_v38 = vld [vmem:[#allocation3 + $0xc8] sm:$0xff]  ;;  %v67_v40 = vld [vmem:[#allocation3 + $0xd8] sm:$0xff] }
  0x1e   :  { %1693 = vmatpush1.bf16.msra.mxu0 %v2430_v24  ;;  %v69_v39 = vld [vmem:[#allocation3 + $0xe8] sm:$0xff]  ;;  %v2445_v41 = vpack.c.bf16 %v62_v36, %v58_v35  ;;  %v71_v43 = vld [vmem:[#allocation3 + $0xf8] sm:$0xff]  ;;  %v64_v44 = vld [vmem:[#allocation3 + $0xc0] sm:$0xff] }
  0x1f   :  { %1725 = vmatpush1.bf16.msra.mxu1 %v2434_v28  ;;  %1695 = vmatprep.subr.bf16.mxu0 %v2436_v29  ;;  %v2447_v42 = vpack.c.bf16 %v69_v39, %v65_v38  ;;  %v68_v45 = vld [vmem:[#allocation3 + $0xe0] sm:$0xff]  ;;  %v2450_v46 = vpack.c.bf16 %v71_v43, %v67_v40  ;;  %v66_v47 = vld [vmem:[#allocation3 + $0xd0] sm:$0xff]  ;;  %v73_v49 = vld [vmem:[#allocation3 + $0x108] sm:$0xff] }
  0x20   :  { %1727 = vmatprep.subr.bf16.mxu1 %v2438_v33  ;;  %v70_v48 = vld [vmem:[#allocation3 + $0xf0] sm:$0xff]  ;;  %v77_v50 = vld [vmem:[#allocation3 + $0x128] sm:$0xff]  ;;  %v75_v51 = vld [vmem:[#allocation3 + $0x118] sm:$0xff]  ;;  %v2453_v53 = vpack.c.bf16 %v68_v45, %v64_v44 }
  0x21   :  { %v79_v52 = vld [vmem:[#allocation3 + $0x138] sm:$0xff]  ;;  %v2457_v54 = vpack.c.bf16 %v70_v48, %v66_v47  ;;  %v2459_v55 = vpack.c.bf16 %v77_v50, %v73_v49  ;;  %v72_v56 = vld [vmem:[#allocation3 + $0x100] sm:$0xff]  ;;  %v74_v58 = vld [vmem:[#allocation3 + $0x110] sm:$0xff] }
  0x22   :  { %1697 = vmatpush1.bf16.msra.mxu0 %v2441_v37  ;;  %v76_v57 = vld [vmem:[#allocation3 + $0x120] sm:$0xff]  ;;  %v2462_v59 = vpack.c.bf16 %v79_v52, %v75_v51  ;;  %v78_v60 = vld [vmem:[#allocation3 + $0x130] sm:$0xff]  ;;  %v81_v61 = vld [vmem:[#allocation3 + $0x148] sm:$0xff] }
  0x23   :  { %1729 = vmatpush1.bf16.msra.mxu1 %v2445_v41  ;;  %1699 = vmatprep.subr.bf16.mxu0 %v2447_v42  ;;  %v85_v62 = vld [vmem:[#allocation3 + $0x168] sm:$0xff]  ;;  %v83_v63 = vld [vmem:[#allocation3 + $0x158] sm:$0xff]  ;;  %v2465_v2 = vpack.c.bf16 %v76_v57, %v72_v56  ;;  %v2469_v3 = vpack.c.bf16 %v78_v60, %v74_v58  ;;  %v80_v5 = vld [vmem:[#allocation3 + $0x140] sm:$0xff]  ;;  %v112_v57 = vlaneseq }
  0x24   :  { %1731 = vmatprep.subr.bf16.mxu1 %v2450_v46  ;;  %v87_v0 = vld [vmem:[#allocation3 + $0x178] sm:$0xff]  ;;  %v2471_v4 = vpack.c.bf16 %v85_v62, %v81_v61  ;;  %v84_v7 = vld [vmem:[#allocation3 + $0x160] sm:$0xff]  ;;  %v82_v8 = vld [vmem:[#allocation3 + $0x150] sm:$0xff] }
  0x25   :  { %v2474_v9 = vpack.c.bf16 %v87_v0, %v83_v63  ;;  %v86_v12 = vld [vmem:[#allocation3 + $0x170] sm:$0xff]  ;;  %v89_v13 = vld [vmem:[#allocation3 + $0x188] sm:$0xff]  ;;  %v91_v16 = vld [vmem:[#allocation3 + $0x198] sm:$0xff]  ;;  %v2477_v18 = vpack.c.bf16 %v84_v7, %v80_v5  ;;  %v113_v58 = vshrl.u32 %v112_v57, 7 }
  0x26   :  { %1701 = vmatpush1.bf16.msra.mxu0 %v2453_v53  ;;  %v93_v14 = vld [vmem:[#allocation3 + $0x1a8] sm:$0xff]  ;;  %v95_v17 = vld [vmem:[#allocation3 + $0x1b8] sm:$0xff]  ;;  %v88_v21 = vld [vmem:[#allocation3 + $0x180] sm:$0xff]  ;;  %v2481_v22 = vpack.c.bf16 %v86_v12, %v82_v8 }
  0x27   :  { %1733 = vmatpush1.bf16.msra.mxu1 %v2457_v54  ;;  %1703 = vmatprep.subr.bf16.mxu0 %v2459_v55  ;;  %v2483_v23 = vpack.c.bf16 %v93_v14, %v89_v13  ;;  %v92_v25 = vld [vmem:[#allocation3 + $0x1a0] sm:$0xff]  ;;  %v90_v26 = vld [vmem:[#allocation3 + $0x190] sm:$0xff]  ;;  %v2489_v30 = vpack.c.bf16 %v95_v17, %v91_v16  ;;  %v97_v32 = vld [vmem:[#allocation3 + $0x1c8] sm:$0xff]  ;;  %v114_v60 = vsub.s32 0, %v113_v58  ;;  %v118_v62 = vsub.s32 1, %v113_v58 }
  0x28   :  { %1735 = vmatprep.subr.bf16.mxu1 %v2462_v59  ;;  %v105_v27 = vld [vmem:[%s2890_s0] sm:$0x3]  ;;  %v94_v31 = vld [vmem:[#allocation3 + $0x1b0] sm:$0xff]  ;;  %v101_v34 = vld [vmem:[#allocation3 + $0x1e8] sm:$0xff]  ;;  %v2495_v39 = vpack.c.bf16 %v92_v25, %v88_v21  ;;  %v126_v8 = vsub.s32 3, %v113_v58  ;;  %v122_v25 = vsub.s32 2, %v113_v58 }
  0x29   :  { %108 = vperm.xlu0 %2203, %v105_v27   ;;  %v99_v35 = vld [vmem:[#allocation3 + $0x1d8] sm:$0xff]  ;;  %v1656_v38 = vld [vmem:[%s2890_s0 + $0x2] sm:$0x3]  ;;  %v2499_v40 = vpack.c.bf16 %v94_v31, %v90_v26  ;;  %v2501_v43 = vpack.c.bf16 %v101_v34, %v97_v32  ;;  %v98_v48 = vld [vmem:[#allocation3 + $0x1d0] sm:$0xff] }
  0x2a   :  { %1705 = vmatpush1.bf16.msra.mxu0 %v2465_v2  ;;  %v103_v36 = vld [vmem:[#allocation3 + $0x1f8] sm:$0xff]  ;;  %v96_v44 = vld [vmem:[#allocation3 + $0x1c0] sm:$0xff]  ;;  %v102_v49 = vld [vmem:[#allocation3 + $0x1f0] sm:$0xff] }
  0x2b   :  { %1737 = vmatpush1.bf16.msra.mxu1 %v2469_v3  ;;  %1707 = vmatprep.subr.bf16.mxu0 %v2471_v4  ;;  %v100_v45 = vld [vmem:[#allocation3 + $0x1e0] sm:$0xff]  ;;  %v2504_v47 = vpack.c.bf16 %v103_v36, %v99_v35  ;;  %v2514_v52 = vpack.c.bf16 %v102_v49, %v98_v48  ;;  %v1676_v56 = vld [vmem:[%s2890_s0 + $0xc] sm:$0x3] }
  0x2c   :  { %1739 = vmatprep.subr.bf16.mxu1 %v2474_v9  ;;  %v1668_v50 = vld [vmem:[%s2890_s0 + $0x8] sm:$0x3]  ;;  %v2510_v51 = vpack.c.bf16 %v100_v45, %v96_v44  ;;  %v39_v61 = vld [vmem:[%s2891_s1] sm:$0xf] }
  0x2d   :  { %335 = vperm.xlu0 %2203, %v1656_v38   ;;  %v2563_v63 = vrot.slane %v39_v61, %v114_v60  ;;  %v104_v0 = vld [vmem:[%s2893_s3] sm:$0xf]  ;;  %v2568_v5 = vrot.slane %v39_v61, %v118_v62  ;;  %v2576_v17 = vrot.slane %v39_v61, %v126_v8  ;;  %v2583_v35 = vrot.slane %v39_v61, %v122_v25 }
  0x2e   :  { %1709 = vmatpush1.bf16.msra.mxu0 %v2477_v18  ;;  %v2571_v13 = vrot.slane %v104_v0, %v114_v60  ;;  %v2574_v16 = vrot.slane %v104_v0, %v118_v62  ;;  %v2581_v32 = vrot.slane %v104_v0, %v126_v8  ;;  %v2587_v57 = vrot.slane %v104_v0, %v122_v25 }
  0x2f   :  { %1741 = vmatpush1.bf16.msra.mxu1 %v2481_v22  ;;  %1711 = vmatprep.subr.bf16.mxu0 %v2483_v23 }
  0x30   :  { %1743 = vmatprep.subr.bf16.mxu1 %v2489_v30 }
  0x31   :  { %890 = vperm.xlu0 %2203, %v1668_v50  }
  0x32   :  { %1713 = vmatpush1.bf16.msra.mxu0 %v2495_v39 }
  0x33   :  { %1745 = vmatpush1.bf16.msra.mxu1 %v2499_v40  ;;  %1715 = vmatprep.subr.bf16.mxu0 %v2501_v43 }
  0x34   :  { %1747 = vmatprep.subr.bf16.mxu1 %v2504_v47 }
  0x35   :  { %1260 = vperm.xlu0 %2203, %v1676_v56  }
  0x36   :  { %1717 = vmatpush1.bf16.msra.mxu0 %v2510_v51 }
  0x37   :  { %1749 = vmatpush1.bf16.msra.mxu1 %v2514_v52  ;;  %1751 = vmatprep.subr.bf16.mxu0 %v2414_v6 }
  0x38   :  { %1783 = vmatprep.subr.bf16.mxu1 %v2416_v10 }
  0x39   :  { %226 = vmatmul.mubr.f32.vlgmr.msra.gmra.mrb[0].mxu0 %v2360_v1 }
  0x3a   :  { %297 = vmatmul.mubr.f32.vlgmr.msra.gmra.mrb[0].mxu1 %v2360_v1  ;;  %1753 = vmatpush1.bf16.msra.mxu0 %v2418_v11 }
  0x3b   :  { %1785 = vmatpush1.bf16.msra.mxu1 %v2421_v15  ;;  %1755 = vmatprep.subr.bf16.mxu0 %v2425_v19 }
  0x3c   :  { %1787 = vmatprep.subr.bf16.mxu1 %v2427_v20  ;;  %410 = vmatprep.mubr.f32.mxu0 %v2360_v1 }
  0x3d   :  { %481 = vmatprep.mubr.f32.mxu1 %v2360_v1 }
  0x3e   :  { %1757 = vmatpush1.bf16.msra.mxu0 %v2430_v24 }
  0x3f   :  { %1789 = vmatpush1.bf16.msra.mxu1 %v2434_v28  ;;  %1759 = vmatprep.subr.bf16.mxu0 %v2436_v29 }
  0x40   :  { %1791 = vmatprep.subr.bf16.mxu1 %v2438_v33 }
  0x42   :  { %1761 = vmatpush1.bf16.msra.mxu0 %v2441_v37 }
  0x43   :  { %1793 = vmatpush1.bf16.msra.mxu1 %v2445_v41  ;;  %1763 = vmatprep.subr.bf16.mxu0 %v2447_v42 }
  0x44   :  { %1795 = vmatprep.subr.bf16.mxu1 %v2450_v46 }
  0x46   :  { %1765 = vmatpush1.bf16.msra.mxu0 %v2453_v53 }
  0x47   :  { %1797 = vmatpush1.bf16.msra.mxu1 %v2457_v54  ;;  %1767 = vmatprep.subr.bf16.mxu0 %v2459_v55 }
  0x48   :  { %1799 = vmatprep.subr.bf16.mxu1 %v2462_v59 }
  0x4a   :  { %1769 = vmatpush1.bf16.msra.mxu0 %v2465_v2 }
  0x4b   :  { %1801 = vmatpush1.bf16.msra.mxu1 %v2469_v3  ;;  %1771 = vmatprep.subr.bf16.mxu0 %v2471_v4 }
  0x4c   :  { %1803 = vmatprep.subr.bf16.mxu1 %v2474_v9 }
  0x4e   :  { %1773 = vmatpush1.bf16.msra.mxu0 %v2477_v18 }
  0x4f   :  { %1805 = vmatpush1.bf16.msra.mxu1 %v2481_v22  ;;  %1775 = vmatprep.subr.bf16.mxu0 %v2483_v23 }
  0x50   :  { %1807 = vmatprep.subr.bf16.mxu1 %v2489_v30 }
  0x52   :  { %1777 = vmatpush1.bf16.msra.mxu0 %v2495_v39 }
  0x53   :  { %1809 = vmatpush1.bf16.msra.mxu1 %v2499_v40  ;;  %1779 = vmatprep.subr.bf16.mxu0 %v2501_v43 }
  0x54   :  { %1811 = vmatprep.subr.bf16.mxu1 %v2504_v47 }
  0x56   :  { %1781 = vmatpush1.bf16.msra.mxu0 %v2510_v51 }
  0x57   :  { %1813 = vmatpush1.bf16.msra.mxu1 %v2514_v52  ;;  %1815 = vmatprep.subr.bf16.mxu0 %v2414_v6 }
  0x58   :  { %1847 = vmatprep.subr.bf16.mxu1 %v2416_v10 }
  0xa8   :  { %v109_v7 = vpop.permute.xlu0 %108 }
  0xa9   :  { %v132_v12 = vmul.f32 %v2563_v63, %v109_v7  ;;  %v133_v14 = vmul.f32 %v2568_v5, %v109_v7  ;;  %v135_v31 = vmul.f32 %v2576_v17, %v109_v7  ;;  %v134_v56 = vmul.f32 %v2583_v35, %v109_v7 }
  0xab   :  { %v157_v21 = vadd.f32 %v2571_v13, %v132_v12  ;;  %v158_v26 = vadd.f32 %v2574_v16, %v133_v14  ;;  %v160_v50 = vadd.f32 %v2581_v32, %v135_v31  ;;  %v159_v60 = vadd.f32 %v2587_v57, %v134_v56  ;;  %v1680_v56 = vld [vmem:[%s2890_s0 + $0xe] sm:$0x3] }
 0x10c   :  { %v227_v27 = vpop.f32.mrb[0].mxu0 }
 0x10d   :  { %v303_v34 = vadd.f32 %v227_v27, %v157_v21  ;;  %v298_v36 = vpop.f32.mrb[0].mxu1  ;;  %v229_v38 = vpop.f32.mrb[1].mxu0 }
 0x10e   :  { %v304_v44 = vadd.f32 %v229_v38, %v158_v26  ;;  %v300_v45 = vpop.f32.mrb[1].mxu1  ;;  %v305_v61 = vadd.f32 %v298_v36, %v159_v60 }
 0x10f   :  { %v1653_v48 = vmul.f32 -1.442695, %v303_v34  ;;  %v306_v58 = vadd.f32 %v300_v45, %v160_v50  ;;  %v1672_v50 = vld [vmem:[%s2890_s0 + $0xa] sm:$0x3] }
 0x110   :  { %v1654_v49 = vmul.f32 -1.442695, %v304_v44 }
 0x111   :  { %2205 = vpow2.f32 %v1653_v48  ;;  %v1655_v62 = vmul.f32 -1.442695, %v306_v58  ;;  %v1660_v48 = vld [vmem:[%s2890_s0 + $0x4] sm:$0x3]  ;;  %v336_v58 = vpop.permute.xlu0 %335 }
 0x112   :  { %2207 = vpow2.f32 %v1654_v49  ;;  %520 = vperm.xlu1 %2204, %v1660_v48   ;;  %v1664_v49 = vld [vmem:[%s2890_s0 + $0x6] sm:$0x3]  ;;  %v338_v60 = vmul.f32 %v336_v58, %v2563_v63 }
 0x113   :  { %2209 = vpow2.f32 %v1655_v62  ;;  %v339_v62 = vmul.f32 %v336_v58, %v2568_v5 }
 0x114   :  { %2211 = vtanh.f32 %v305_v61  ;;  %v342_v61 = vadd.f32 %v338_v60, %v2571_v13 }
 0x116   :  { %705 = vperm.xlu1 %2204, %v1664_v49  }
 0x11a   :  { %1075 = vperm.xlu1 %2204, %v1672_v50  }
 0x11b   :  { %v2206_v8 = vpop.eup %2205 }
 0x11c   :  { %v2208_v12 = vpop.eup %2207  ;;  %v310_v14 = vadd.f32 1.0, %v2206_v8 }
 0x11d   :  { %v316_v21 = vadd.f32 1.0, %v2208_v12  ;;  %v2210_v26 = vpop.eup %2209 }
 0x11e   :  { %2213 = vrcp.f32 %v310_v14  ;;  %v2212_v27 = vpop.eup %2211  ;;  %v323_v25 = vadd.f32 1.0, %v2210_v26  ;;  %1445 = vperm.xlu1 %2204, %v1680_v56   ;;  %v343_v14 = vadd.f32 %v339_v62, %v2574_v16 }
 0x11f   :  { %2215 = vrcp.f32 %v316_v21 }
 0x120   :  { %2217 = vrcp.f32 %v323_v25 }
 0x128   :  { %v2214_v31 = vpop.eup %2213 }
 0x129   :  { %v2216_v7 = vpop.eup %2215  ;;  %v327_v0 = vmul.f32 %v2214_v31, %v2212_v27 }
 0x12a   :  { %v326_v34 = vmul.f32 0.0, %v2216_v7  ;;  %v2218_v36 = vpop.eup %2217  ;;  %v341_v7 = vmul.f32 %v336_v58, %v2576_v17 }
 0x12c   :  { %v2590_v38 = vadd.f32 %v327_v0, %v326_v34  ;;  %v345_v34 = vadd.f32 %v341_v7, %v2581_v32 }
 0x12e   :  { %2219 = vtanh.f32 %v2590_v38 }
 0x138   :  { %v2220_v44 = vpop.eup %2219 }
 0x139   :  { %v330_v45 = vmul.f32 %v2220_v44, %v2218_v36  ;;  %v340_v36 = vmul.f32 %v336_v58, %v2583_v35 }
 0x13b   :  { %411 = vmatmul.mubr.f32.vlgmr.msra.gmra.mrb[2].mxu0 %v330_v45  ;;  %482 = vmatmul.mubr.f32.vlgmr.msra.gmra.mrb[2].mxu1 %v330_v45  ;;  %v344_v45 = vadd.f32 %v340_v36, %v2587_v57 }
 0x13c   :  { %1817 = vmatpush1.bf16.msra.mxu0 %v2418_v11  ;;  %1849 = vmatpush1.bf16.msra.mxu1 %v2421_v15 }
 0x13d   :  { %1819 = vmatprep.subr.bf16.mxu0 %v2425_v19  ;;  %1851 = vmatprep.subr.bf16.mxu1 %v2427_v20 }
 0x13e   :  { %595 = vmatprep.mubr.f32.mxu0 %v2360_v1  ;;  %666 = vmatprep.mubr.f32.mxu1 %v2360_v1 }
 0x140   :  { %1821 = vmatpush1.bf16.msra.mxu0 %v2430_v24  ;;  %1853 = vmatpush1.bf16.msra.mxu1 %v2434_v28 }
 0x141   :  { %1823 = vmatprep.subr.bf16.mxu0 %v2436_v29  ;;  %1855 = vmatprep.subr.bf16.mxu1 %v2438_v33 }
 0x144   :  { %1825 = vmatpush1.bf16.msra.mxu0 %v2441_v37  ;;  %1857 = vmatpush1.bf16.msra.mxu1 %v2445_v41 }
 0x145   :  { %1827 = vmatprep.subr.bf16.mxu0 %v2447_v42  ;;  %1859 = vmatprep.subr.bf16.mxu1 %v2450_v46 }
 0x148   :  { %1829 = vmatpush1.bf16.msra.mxu0 %v2453_v53  ;;  %1861 = vmatpush1.bf16.msra.mxu1 %v2457_v54 }
 0x149   :  { %1831 = vmatprep.subr.bf16.mxu0 %v2459_v55  ;;  %1863 = vmatprep.subr.bf16.mxu1 %v2462_v59 }
 0x14c   :  { %1833 = vmatpush1.bf16.msra.mxu0 %v2465_v2  ;;  %1865 = vmatpush1.bf16.msra.mxu1 %v2469_v3 }
 0x14d   :  { %1835 = vmatprep.subr.bf16.mxu0 %v2471_v4  ;;  %1867 = vmatprep.subr.bf16.mxu1 %v2474_v9 }
 0x150   :  { %1837 = vmatpush1.bf16.msra.mxu0 %v2477_v18  ;;  %1869 = vmatpush1.bf16.msra.mxu1 %v2481_v22 }
 0x151   :  { %1839 = vmatprep.subr.bf16.mxu0 %v2483_v23  ;;  %1871 = vmatprep.subr.bf16.mxu1 %v2489_v30 }
 0x154   :  { %1841 = vmatpush1.bf16.msra.mxu0 %v2495_v39  ;;  %1873 = vmatpush1.bf16.msra.mxu1 %v2499_v40 }
 0x155   :  { %1843 = vmatprep.subr.bf16.mxu0 %v2501_v43  ;;  %1875 = vmatprep.subr.bf16.mxu1 %v2504_v47 }
 0x158   :  { %1845 = vmatpush1.bf16.msra.mxu0 %v2510_v51  ;;  %1877 = vmatpush1.bf16.msra.mxu1 %v2514_v52 }
 0x159   :  { %1879 = vmatprep.subr.bf16.mxu0 %v2414_v6  ;;  %1911 = vmatprep.subr.bf16.mxu1 %v2416_v10 }
 0x20e   :  { %v412_v8 = vpop.f32.mrb[2].mxu0  ;;  %v483_v12 = vpop.f32.mrb[2].mxu1 }
 0x20f   :  { %v488_v21 = vadd.f32 %v412_v8, %v342_v61  ;;  %v414_v26 = vpop.f32.mrb[3].mxu0  ;;  %v485_v27 = vpop.f32.mrb[3].mxu1  ;;  %v490_v49 = vadd.f32 %v483_v12, %v344_v45 }
 0x210   :  { %v489_v31 = vadd.f32 %v414_v26, %v343_v14  ;;  %v491_v44 = vadd.f32 %v485_v27, %v345_v34 }
 0x211   :  { %v1657_v0 = vmul.f32 -1.442695, %v488_v21 }
 0x212   :  { %v1658_v25 = vmul.f32 -1.442695, %v489_v31  ;;  %v1659_v48 = vmul.f32 -1.442695, %v491_v44 }
 0x213   :  { %2221 = vpow2.f32 %v1657_v0 }
 0x214   :  { %2223 = vpow2.f32 %v1658_v25 }
 0x215   :  { %2225 = vpow2.f32 %v1659_v48 }
 0x216   :  { %2227 = vtanh.f32 %v490_v49 }
 0x21d   :  { %v2222_v50 = vpop.eup %2221 }
 0x21e   :  { %v2224_v56 = vpop.eup %2223  ;;  %v495_v60 = vadd.f32 1.0, %v2222_v50 }
 0x21f   :  { %v501_v62 = vadd.f32 1.0, %v2224_v56  ;;  %v2226_v61 = vpop.eup %2225 }
 0x220   :  { %2229 = vrcp.f32 %v495_v60  ;;  %v2228_v8 = vpop.eup %2227  ;;  %v508_v31 = vadd.f32 1.0, %v2226_v61 }
 0x221   :  { %2231 = vrcp.f32 %v501_v62 }
 0x222   :  { %2233 = vrcp.f32 %v508_v31 }
 0x22a   :  { %v2230_v14 = vpop.eup %2229 }
 0x22b   :  { %v2232_v21 = vpop.eup %2231  ;;  %v512_v26 = vmul.f32 %v2230_v14, %v2228_v8 }
 0x22c   :  { %v511_v58 = vmul.f32 %v2232_v21, %v2590_v38  ;;  %v2234_v12 = vpop.eup %2233  ;;  %v521_v38 = vpop.permute.xlu1 %520 }
 0x22d   :  { %v523_v25 = vmul.f32 %v521_v38, %v2563_v63  ;;  %v524_v34 = vmul.f32 %v521_v38, %v2568_v5  ;;  %v526_v49 = vmul.f32 %v521_v38, %v2576_v17  ;;  %v525_v21 = vmul.f32 %v521_v38, %v2583_v35 }
 0x22e   :  { %v2648_v27 = vadd.f32 %v512_v26, %v511_v58 }
 0x22f   :  { %v527_v36 = vadd.f32 %v523_v25, %v2571_v13  ;;  %v528_v44 = vadd.f32 %v524_v34, %v2574_v16  ;;  %v530_v14 = vadd.f32 %v526_v49, %v2581_v32  ;;  %v529_v31 = vadd.f32 %v525_v21, %v2587_v57 }
 0x230   :  { %2235 = vtanh.f32 %v2648_v27 }
 0x23a   :  { %v2236_v7 = vpop.eup %2235 }
 0x23b   :  { %v515_v0 = vmul.f32 %v2236_v7, %v2234_v12 }
 0x23d   :  { %596 = vmatmul.mubr.f32.vlgmr.msra.gmra.mrb[4].mxu0 %v515_v0  ;;  %667 = vmatmul.mubr.f32.vlgmr.msra.gmra.mrb[4].mxu1 %v515_v0 }
 0x23e   :  { %1881 = vmatpush1.bf16.msra.mxu0 %v2418_v11  ;;  %1913 = vmatpush1.bf16.msra.mxu1 %v2421_v15 }
 0x23f   :  { %1883 = vmatprep.subr.bf16.mxu0 %v2425_v19  ;;  %1915 = vmatprep.subr.bf16.mxu1 %v2427_v20 }
 0x240   :  { %780 = vmatprep.mubr.f32.mxu0 %v2360_v1  ;;  %851 = vmatprep.mubr.f32.mxu1 %v2360_v1 }
 0x242   :  { %1885 = vmatpush1.bf16.msra.mxu0 %v2430_v24  ;;  %1917 = vmatpush1.bf16.msra.mxu1 %v2434_v28 }
 0x243   :  { %1887 = vmatprep.subr.bf16.mxu0 %v2436_v29  ;;  %1919 = vmatprep.subr.bf16.mxu1 %v2438_v33 }
 0x246   :  { %1889 = vmatpush1.bf16.msra.mxu0 %v2441_v37  ;;  %1921 = vmatpush1.bf16.msra.mxu1 %v2445_v41 }
 0x247   :  { %1891 = vmatprep.subr.bf16.mxu0 %v2447_v42  ;;  %1923 = vmatprep.subr.bf16.mxu1 %v2450_v46 }
 0x24a   :  { %1893 = vmatpush1.bf16.msra.mxu0 %v2453_v53  ;;  %1925 = vmatpush1.bf16.msra.mxu1 %v2457_v54 }
 0x24b   :  { %1895 = vmatprep.subr.bf16.mxu0 %v2459_v55  ;;  %1927 = vmatprep.subr.bf16.mxu1 %v2462_v59 }
 0x24e   :  { %1897 = vmatpush1.bf16.msra.mxu0 %v2465_v2  ;;  %1929 = vmatpush1.bf16.msra.mxu1 %v2469_v3 }
 0x24f   :  { %1899 = vmatprep.subr.bf16.mxu0 %v2471_v4  ;;  %1931 = vmatprep.subr.bf16.mxu1 %v2474_v9 }
 0x252   :  { %1901 = vmatpush1.bf16.msra.mxu0 %v2477_v18  ;;  %1933 = vmatpush1.bf16.msra.mxu1 %v2481_v22 }
 0x253   :  { %1903 = vmatprep.subr.bf16.mxu0 %v2483_v23  ;;  %1935 = vmatprep.subr.bf16.mxu1 %v2489_v30 }
 0x256   :  { %1905 = vmatpush1.bf16.msra.mxu0 %v2495_v39  ;;  %1937 = vmatpush1.bf16.msra.mxu1 %v2499_v40 }
 0x257   :  { %1907 = vmatprep.subr.bf16.mxu0 %v2501_v43  ;;  %1939 = vmatprep.subr.bf16.mxu1 %v2504_v47 }
 0x25a   :  { %1909 = vmatpush1.bf16.msra.mxu0 %v2510_v51  ;;  %1941 = vmatpush1.bf16.msra.mxu1 %v2514_v52 }
 0x25b   :  { %1943 = vmatprep.subr.bf16.mxu0 %v2414_v6  ;;  %1975 = vmatprep.subr.bf16.mxu1 %v2416_v10 }
 0x310   :  { %v597_v45 = vpop.f32.mrb[4].mxu0  ;;  %v668_v48 = vpop.f32.mrb[4].mxu1 }
 0x311   :  { %v673_v50 = vadd.f32 %v597_v45, %v527_v36  ;;  %v599_v56 = vpop.f32.mrb[5].mxu0  ;;  %v670_v60 = vpop.f32.mrb[5].mxu1  ;;  %v675_v12 = vadd.f32 %v668_v48, %v529_v31 }
 0x312   :  { %v674_v62 = vadd.f32 %v599_v56, %v528_v44  ;;  %v676_v26 = vadd.f32 %v670_v60, %v530_v14 }
 0x313   :  { %v1661_v61 = vmul.f32 -1.442695, %v673_v50 }
 0x314   :  { %v1662_v8 = vmul.f32 -1.442695, %v674_v62  ;;  %v1663_v58 = vmul.f32 -1.442695, %v676_v26 }
 0x315   :  { %2237 = vpow2.f32 %v1661_v61 }
 0x316   :  { %2239 = vpow2.f32 %v1662_v8 }
 0x317   :  { %2241 = vpow2.f32 %v1663_v58 }
 0x318   :  { %2243 = vtanh.f32 %v675_v12 }
 0x31f   :  { %v2238_v7 = vpop.eup %2237 }
 0x320   :  { %v2240_v0 = vpop.eup %2239  ;;  %v680_v25 = vadd.f32 1.0, %v2238_v7 }
 0x321   :  { %v686_v34 = vadd.f32 1.0, %v2240_v0  ;;  %v2242_v36 = vpop.eup %2241 }
 0x322   :  { %2245 = vrcp.f32 %v680_v25  ;;  %v2244_v44 = vpop.eup %2243  ;;  %v693_v38 = vadd.f32 1.0, %v2242_v36 }
 0x323   :  { %2247 = vrcp.f32 %v686_v34 }
 0x324   :  { %2249 = vrcp.f32 %v693_v38 }
 0x32c   :  { %v2246_v45 = vpop.eup %2245 }
 0x32d   :  { %v2248_v49 = vpop.eup %2247  ;;  %v697_v50 = vmul.f32 %v2246_v45, %v2244_v44 }
 0x32e   :  { %v696_v56 = vmul.f32 %v2248_v49, %v2648_v27  ;;  %v2250_v48 = vpop.eup %2249  ;;  %v706_v27 = vpop.permute.xlu1 %705 }
 0x32f   :  { %v708_v8 = vmul.f32 %v706_v27, %v2563_v63  ;;  %v709_v14 = vmul.f32 %v706_v27, %v2568_v5  ;;  %v711_v34 = vmul.f32 %v706_v27, %v2576_v17  ;;  %v710_v49 = vmul.f32 %v706_v27, %v2583_v35 }
 0x330   :  { %v2694_v60 = vadd.f32 %v697_v50, %v696_v56 }
 0x331   :  { %v712_v21 = vadd.f32 %v708_v8, %v2571_v13  ;;  %v713_v58 = vadd.f32 %v709_v14, %v2574_v16  ;;  %v715_v45 = vadd.f32 %v711_v34, %v2581_v32  ;;  %v714_v38 = vadd.f32 %v710_v49, %v2587_v57 }
 0x332   :  { %2251 = vtanh.f32 %v2694_v60 }
 0x33c   :  { %v2252_v62 = vpop.eup %2251 }
 0x33d   :  { %v700_v61 = vmul.f32 %v2252_v62, %v2250_v48 }
 0x33f   :  { %781 = vmatmul.mubr.f32.vlgmr.msra.gmra.mrb[6].mxu0 %v700_v61  ;;  %852 = vmatmul.mubr.f32.vlgmr.msra.gmra.mrb[6].mxu1 %v700_v61 }
 0x340   :  { %1945 = vmatpush1.bf16.msra.mxu0 %v2418_v11  ;;  %1977 = vmatpush1.bf16.msra.mxu1 %v2421_v15 }
 0x341   :  { %1947 = vmatprep.subr.bf16.mxu0 %v2425_v19  ;;  %1979 = vmatprep.subr.bf16.mxu1 %v2427_v20 }
 0x342   :  { %965 = vmatprep.mubr.f32.mxu0 %v2360_v1  ;;  %1036 = vmatprep.mubr.f32.mxu1 %v2360_v1 }
 0x344   :  { %1949 = vmatpush1.bf16.msra.mxu0 %v2430_v24  ;;  %1981 = vmatpush1.bf16.msra.mxu1 %v2434_v28 }
 0x345   :  { %1951 = vmatprep.subr.bf16.mxu0 %v2436_v29  ;;  %1983 = vmatprep.subr.bf16.mxu1 %v2438_v33 }
 0x348   :  { %1953 = vmatpush1.bf16.msra.mxu0 %v2441_v37  ;;  %1985 = vmatpush1.bf16.msra.mxu1 %v2445_v41 }
 0x349   :  { %1955 = vmatprep.subr.bf16.mxu0 %v2447_v42  ;;  %1987 = vmatprep.subr.bf16.mxu1 %v2450_v46 }
 0x34c   :  { %1957 = vmatpush1.bf16.msra.mxu0 %v2453_v53  ;;  %1989 = vmatpush1.bf16.msra.mxu1 %v2457_v54 }
 0x34d   :  { %1959 = vmatprep.subr.bf16.mxu0 %v2459_v55  ;;  %1991 = vmatprep.subr.bf16.mxu1 %v2462_v59 }
 0x350   :  { %1961 = vmatpush1.bf16.msra.mxu0 %v2465_v2  ;;  %1993 = vmatpush1.bf16.msra.mxu1 %v2469_v3 }
 0x351   :  { %1963 = vmatprep.subr.bf16.mxu0 %v2471_v4  ;;  %1995 = vmatprep.subr.bf16.mxu1 %v2474_v9 }
 0x354   :  { %1965 = vmatpush1.bf16.msra.mxu0 %v2477_v18  ;;  %1997 = vmatpush1.bf16.msra.mxu1 %v2481_v22 }
 0x355   :  { %1967 = vmatprep.subr.bf16.mxu0 %v2483_v23  ;;  %1999 = vmatprep.subr.bf16.mxu1 %v2489_v30 }
 0x358   :  { %1969 = vmatpush1.bf16.msra.mxu0 %v2495_v39  ;;  %2001 = vmatpush1.bf16.msra.mxu1 %v2499_v40 }
 0x359   :  { %1971 = vmatprep.subr.bf16.mxu0 %v2501_v43  ;;  %2003 = vmatprep.subr.bf16.mxu1 %v2504_v47 }
 0x35c   :  { %1973 = vmatpush1.bf16.msra.mxu0 %v2510_v51  ;;  %2005 = vmatpush1.bf16.msra.mxu1 %v2514_v52 }
 0x35d   :  { %2007 = vmatprep.subr.bf16.mxu0 %v2414_v6  ;;  %2039 = vmatprep.subr.bf16.mxu1 %v2416_v10 }
 0x412   :  { %v782_v26 = vpop.f32.mrb[6].mxu0  ;;  %v853_v31 = vpop.f32.mrb[6].mxu1 }
 0x413   :  { %v858_v12 = vadd.f32 %v782_v26, %v712_v21  ;;  %v784_v7 = vpop.f32.mrb[7].mxu0  ;;  %v855_v0 = vpop.f32.mrb[7].mxu1  ;;  %v860_v48 = vadd.f32 %v853_v31, %v714_v38 }
 0x414   :  { %v859_v25 = vadd.f32 %v784_v7, %v713_v58  ;;  %v861_v50 = vadd.f32 %v855_v0, %v715_v45 }
 0x415   :  { %v1665_v36 = vmul.f32 -1.442695, %v858_v12 }
 0x416   :  { %v1666_v44 = vmul.f32 -1.442695, %v859_v25  ;;  %v1667_v56 = vmul.f32 -1.442695, %v861_v50 }
 0x417   :  { %2253 = vpow2.f32 %v1665_v36 }
 0x418   :  { %2255 = vpow2.f32 %v1666_v44 }
 0x419   :  { %2257 = vpow2.f32 %v1667_v56 }
 0x41a   :  { %2259 = vtanh.f32 %v860_v48 }
 0x421   :  { %v2254_v62 = vpop.eup %2253 }
 0x422   :  { %v2256_v61 = vpop.eup %2255  ;;  %v865_v8 = vadd.f32 1.0, %v2254_v62 }
 0x423   :  { %v871_v14 = vadd.f32 1.0, %v2256_v61  ;;  %v2258_v21 = vpop.eup %2257 }
 0x424   :  { %2261 = vrcp.f32 %v865_v8  ;;  %v2260_v26 = vpop.eup %2259  ;;  %v878_v25 = vadd.f32 1.0, %v2258_v21 }
 0x425   :  { %2263 = vrcp.f32 %v871_v14 }
 0x426   :  { %2265 = vrcp.f32 %v878_v25 }
 0x42e   :  { %v2262_v58 = vpop.eup %2261 }
 0x42f   :  { %v2264_v12 = vpop.eup %2263  ;;  %v882_v7 = vmul.f32 %v2262_v58, %v2260_v26 }
 0x430   :  { %v881_v27 = vmul.f32 %v2264_v12, %v2694_v60  ;;  %v2266_v31 = vpop.eup %2265  ;;  %v891_v60 = vpop.permute.xlu0 %890 }
 0x431   :  { %v893_v44 = vmul.f32 %v891_v60, %v2563_v63  ;;  %v894_v45 = vmul.f32 %v891_v60, %v2568_v5  ;;  %v896_v14 = vmul.f32 %v891_v60, %v2576_v17  ;;  %v895_v12 = vmul.f32 %v891_v60, %v2583_v35 }
 0x432   :  { %v2740_v0 = vadd.f32 %v882_v7, %v881_v27 }
 0x433   :  { %v897_v49 = vadd.f32 %v893_v44, %v2571_v13  ;;  %v898_v56 = vadd.f32 %v894_v45, %v2574_v16  ;;  %v900_v58 = vadd.f32 %v896_v14, %v2581_v32  ;;  %v899_v25 = vadd.f32 %v895_v12, %v2587_v57 }
 0x434   :  { %2267 = vtanh.f32 %v2740_v0 }
 0x43e   :  { %v2268_v34 = vpop.eup %2267 }
 0x43f   :  { %v885_v36 = vmul.f32 %v2268_v34, %v2266_v31 }
 0x441   :  { %966 = vmatmul.mubr.f32.vlgmr.msra.gmra.mrb[8].mxu0 %v885_v36  ;;  %1037 = vmatmul.mubr.f32.vlgmr.msra.gmra.mrb[8].mxu1 %v885_v36 }
 0x442   :  { %2009 = vmatpush1.bf16.msra.mxu0 %v2418_v11  ;;  %2041 = vmatpush1.bf16.msra.mxu1 %v2421_v15 }
 0x443   :  { %2011 = vmatprep.subr.bf16.mxu0 %v2425_v19  ;;  %2043 = vmatprep.subr.bf16.mxu1 %v2427_v20 }
 0x444   :  { %1150 = vmatprep.mubr.f32.mxu0 %v2360_v1  ;;  %1221 = vmatprep.mubr.f32.mxu1 %v2360_v1 }
 0x446   :  { %2013 = vmatpush1.bf16.msra.mxu0 %v2430_v24  ;;  %2045 = vmatpush1.bf16.msra.mxu1 %v2434_v28 }
 0x447   :  { %2015 = vmatprep.subr.bf16.mxu0 %v2436_v29  ;;  %2047 = vmatprep.subr.bf16.mxu1 %v2438_v33 }
 0x44a   :  { %2017 = vmatpush1.bf16.msra.mxu0 %v2441_v37  ;;  %2049 = vmatpush1.bf16.msra.mxu1 %v2445_v41 }
 0x44b   :  { %2019 = vmatprep.subr.bf16.mxu0 %v2447_v42  ;;  %2051 = vmatprep.subr.bf16.mxu1 %v2450_v46 }
 0x44e   :  { %2021 = vmatpush1.bf16.msra.mxu0 %v2453_v53  ;;  %2053 = vmatpush1.bf16.msra.mxu1 %v2457_v54 }
 0x44f   :  { %2023 = vmatprep.subr.bf16.mxu0 %v2459_v55  ;;  %2055 = vmatprep.subr.bf16.mxu1 %v2462_v59 }
 0x452   :  { %2025 = vmatpush1.bf16.msra.mxu0 %v2465_v2  ;;  %2057 = vmatpush1.bf16.msra.mxu1 %v2469_v3 }
 0x453   :  { %2027 = vmatprep.subr.bf16.mxu0 %v2471_v4  ;;  %2059 = vmatprep.subr.bf16.mxu1 %v2474_v9 }
 0x456   :  { %2029 = vmatpush1.bf16.msra.mxu0 %v2477_v18  ;;  %2061 = vmatpush1.bf16.msra.mxu1 %v2481_v22 }
 0x457   :  { %2031 = vmatprep.subr.bf16.mxu0 %v2483_v23  ;;  %2063 = vmatprep.subr.bf16.mxu1 %v2489_v30 }
 0x45a   :  { %2033 = vmatpush1.bf16.msra.mxu0 %v2495_v39  ;;  %2065 = vmatpush1.bf16.msra.mxu1 %v2499_v40 }
 0x45b   :  { %2035 = vmatprep.subr.bf16.mxu0 %v2501_v43  ;;  %2067 = vmatprep.subr.bf16.mxu1 %v2504_v47 }
 0x45e   :  { %2037 = vmatpush1.bf16.msra.mxu0 %v2510_v51  ;;  %2069 = vmatpush1.bf16.msra.mxu1 %v2514_v52 }
 0x45f   :  { %2071 = vmatprep.subr.bf16.mxu0 %v2414_v6  ;;  %2103 = vmatprep.subr.bf16.mxu1 %v2416_v10 }
 0x514   :  { %v967_v50 = vpop.f32.mrb[8].mxu0  ;;  %v1038_v38 = vpop.f32.mrb[8].mxu1 }
 0x515   :  { %v1043_v48 = vadd.f32 %v967_v50, %v897_v49  ;;  %v969_v62 = vpop.f32.mrb[9].mxu0  ;;  %v1040_v61 = vpop.f32.mrb[9].mxu1  ;;  %v1045_v31 = vadd.f32 %v1038_v38, %v899_v25 }
 0x516   :  { %v1044_v8 = vadd.f32 %v969_v62, %v898_v56  ;;  %v1046_v7 = vadd.f32 %v1040_v61, %v900_v58 }
 0x517   :  { %v1669_v21 = vmul.f32 -1.442695, %v1043_v48 }
 0x518   :  { %v1670_v26 = vmul.f32 -1.442695, %v1044_v8  ;;  %v1671_v27 = vmul.f32 -1.442695, %v1046_v7 }
 0x519   :  { %2269 = vpow2.f32 %v1669_v21 }
 0x51a   :  { %2271 = vpow2.f32 %v1670_v26 }
 0x51b   :  { %2273 = vpow2.f32 %v1671_v27 }
 0x51c   :  { %2275 = vtanh.f32 %v1045_v31 }
 0x523   :  { %v2270_v34 = vpop.eup %2269 }
 0x524   :  { %v2272_v36 = vpop.eup %2271  ;;  %v1050_v44 = vadd.f32 1.0, %v2270_v34 }
 0x525   :  { %v1056_v45 = vadd.f32 1.0, %v2272_v36  ;;  %v2274_v49 = vpop.eup %2273 }
 0x526   :  { %2277 = vrcp.f32 %v1050_v44  ;;  %v2276_v50 = vpop.eup %2275  ;;  %v1063_v8 = vadd.f32 1.0, %v2274_v49 }
 0x527   :  { %2279 = vrcp.f32 %v1056_v45 }
 0x528   :  { %2281 = vrcp.f32 %v1063_v8 }
 0x530   :  { %v2278_v56 = vpop.eup %2277 }
 0x531   :  { %v2280_v48 = vpop.eup %2279  ;;  %v1067_v62 = vmul.f32 %v2278_v56, %v2276_v50 }
 0x532   :  { %v1066_v60 = vmul.f32 %v2280_v48, %v2740_v0  ;;  %v2282_v38 = vpop.eup %2281  ;;  %v1076_v0 = vpop.permute.xlu1 %1075 }
 0x533   :  { %v1078_v26 = vmul.f32 %v1076_v0, %v2563_v63  ;;  %v1079_v58 = vmul.f32 %v1076_v0, %v2568_v5  ;;  %v1081_v45 = vmul.f32 %v1076_v0, %v2576_v17  ;;  %v1080_v50 = vmul.f32 %v1076_v0, %v2583_v35 }
 0x534   :  { %v2786_v61 = vadd.f32 %v1067_v62, %v1066_v60 }
 0x535   :  { %v1082_v12 = vadd.f32 %v1078_v26, %v2571_v13  ;;  %v1083_v27 = vadd.f32 %v1079_v58, %v2574_v16  ;;  %v1084_v48 = vadd.f32 %v1080_v50, %v2587_v57 }
 0x536   :  { %2283 = vtanh.f32 %v2786_v61 }
 0x540   :  { %v2284_v14 = vpop.eup %2283 }
 0x541   :  { %v1070_v21 = vmul.f32 %v2284_v14, %v2282_v38 }
 0x543   :  { %1151 = vmatmul.mubr.f32.vlgmr.msra.gmra.mrb[10].mxu0 %v1070_v21  ;;  %1222 = vmatmul.mubr.f32.vlgmr.msra.gmra.mrb[10].mxu1 %v1070_v21 }
 0x544   :  { %2073 = vmatpush1.bf16.msra.mxu0 %v2418_v11  ;;  %2105 = vmatpush1.bf16.msra.mxu1 %v2421_v15 }
 0x545   :  { %2075 = vmatprep.subr.bf16.mxu0 %v2425_v19  ;;  %2107 = vmatprep.subr.bf16.mxu1 %v2427_v20 }
 0x546   :  { %1335 = vmatprep.mubr.f32.mxu0 %v2360_v1  ;;  %1406 = vmatprep.mubr.f32.mxu1 %v2360_v1 }
 0x548   :  { %2077 = vmatpush1.bf16.msra.mxu0 %v2430_v24  ;;  %2109 = vmatpush1.bf16.msra.mxu1 %v2434_v28 }
 0x549   :  { %2079 = vmatprep.subr.bf16.mxu0 %v2436_v29  ;;  %2111 = vmatprep.subr.bf16.mxu1 %v2438_v33 }
 0x54c   :  { %2081 = vmatpush1.bf16.msra.mxu0 %v2441_v37  ;;  %2113 = vmatpush1.bf16.msra.mxu1 %v2445_v41 }
 0x54d   :  { %2083 = vmatprep.subr.bf16.mxu0 %v2447_v42  ;;  %2115 = vmatprep.subr.bf16.mxu1 %v2450_v46 }
 0x550   :  { %2085 = vmatpush1.bf16.msra.mxu0 %v2453_v53  ;;  %2117 = vmatpush1.bf16.msra.mxu1 %v2457_v54 }
 0x551   :  { %2087 = vmatprep.subr.bf16.mxu0 %v2459_v55  ;;  %2119 = vmatprep.subr.bf16.mxu1 %v2462_v59 }
 0x554   :  { %2089 = vmatpush1.bf16.msra.mxu0 %v2465_v2  ;;  %2121 = vmatpush1.bf16.msra.mxu1 %v2469_v3 }
 0x555   :  { %2091 = vmatprep.subr.bf16.mxu0 %v2471_v4  ;;  %2123 = vmatprep.subr.bf16.mxu1 %v2474_v9 }
 0x558   :  { %2093 = vmatpush1.bf16.msra.mxu0 %v2477_v18  ;;  %2125 = vmatpush1.bf16.msra.mxu1 %v2481_v22 }
 0x559   :  { %2095 = vmatprep.subr.bf16.mxu0 %v2483_v23  ;;  %2127 = vmatprep.subr.bf16.mxu1 %v2489_v30 }
 0x55c   :  { %2097 = vmatpush1.bf16.msra.mxu0 %v2495_v39  ;;  %2129 = vmatpush1.bf16.msra.mxu1 %v2499_v40 }
 0x55d   :  { %2099 = vmatprep.subr.bf16.mxu0 %v2501_v43  ;;  %2131 = vmatprep.subr.bf16.mxu1 %v2504_v47 }
 0x560   :  { %2101 = vmatpush1.bf16.msra.mxu0 %v2510_v51  ;;  %2133 = vmatpush1.bf16.msra.mxu1 %v2514_v52 }
 0x561   :  { %2135 = vmatprep.subr.bf16.mxu0 %v2414_v6  ;;  %2167 = vmatprep.subr.bf16.mxu1 %v2416_v10  ;;  %v1085_v10 = vadd.f32 %v1081_v45, %v2581_v32 }
 0x616   :  { %v1152_v7 = vpop.f32.mrb[10].mxu0  ;;  %v1223_v25 = vpop.f32.mrb[10].mxu1 }
 0x617   :  { %v1228_v31 = vadd.f32 %v1152_v7, %v1082_v12  ;;  %v1154_v34 = vpop.f32.mrb[11].mxu0  ;;  %v1225_v36 = vpop.f32.mrb[11].mxu1  ;;  %v1230_v8 = vadd.f32 %v1223_v25, %v1084_v48 }
 0x618   :  { %v1229_v44 = vadd.f32 %v1154_v34, %v1083_v27  ;;  %v1231_v56 = vadd.f32 %v1225_v36, %v1085_v10  ;;  %v1446_v10 = vpop.permute.xlu1 %1445 }
 0x619   :  { %v1673_v6 = vmul.f32 -1.442695, %v1228_v31  ;;  %v1448_v50 = vmul.f32 %v1446_v10, %v2563_v63 }
 0x61a   :  { %v1674_v49 = vmul.f32 -1.442695, %v1229_v44  ;;  %v1675_v62 = vmul.f32 -1.442695, %v1231_v56  ;;  %v1449_v56 = vmul.f32 %v1446_v10, %v2568_v5 }
 0x61b   :  { %2285 = vpow2.f32 %v1673_v6  ;;  %v1452_v48 = vadd.f32 %v1448_v50, %v2571_v13 }
 0x61c   :  { %2287 = vpow2.f32 %v1674_v49 }
 0x61d   :  { %2289 = vpow2.f32 %v1675_v62 }
 0x61e   :  { %2291 = vtanh.f32 %v1230_v8 }
 0x625   :  { %v2286_v60 = vpop.eup %2285 }
 0x626   :  { %v2288_v38 = vpop.eup %2287  ;;  %v1235_v14 = vadd.f32 1.0, %v2286_v60  ;;  %v1453_v60 = vadd.f32 %v1449_v56, %v2574_v16 }
 0x627   :  { %v1241_v21 = vadd.f32 1.0, %v2288_v38  ;;  %v2290_v26 = vpop.eup %2289 }
 0x628   :  { %2293 = vrcp.f32 %v1235_v14  ;;  %v2292_v58 = vpop.eup %2291  ;;  %v1248_v31 = vadd.f32 1.0, %v2290_v26  ;;  %v1451_v26 = vmul.f32 %v1446_v10, %v2576_v17 }
 0x629   :  { %2295 = vrcp.f32 %v1241_v21 }
 0x62a   :  { %2297 = vrcp.f32 %v1248_v31 }
 0x632   :  { %v2294_v12 = vpop.eup %2293 }
 0x633   :  { %v2296_v7 = vpop.eup %2295  ;;  %v1252_v27 = vmul.f32 %v2294_v12, %v2292_v58 }
 0x634   :  { %v1251_v0 = vmul.f32 %v2296_v7, %v2786_v61  ;;  %v2298_v25 = vpop.eup %2297 }
 0x636   :  { %v2832_v34 = vadd.f32 %v1252_v27, %v1251_v0 }
 0x638   :  { %2299 = vtanh.f32 %v2832_v34 }
 0x642   :  { %v2300_v36 = vpop.eup %2299 }
 0x643   :  { %v1255_v44 = vmul.f32 %v2300_v36, %v2298_v25 }
 0x645   :  { %1336 = vmatmul.mubr.f32.vlgmr.msra.gmra.mrb[12].mxu0 %v1255_v44  ;;  %1407 = vmatmul.mubr.f32.vlgmr.msra.gmra.mrb[12].mxu1 %v1255_v44 }
 0x646   :  { %2137 = vmatpush1.bf16.msra.mxu0 %v2418_v11  ;;  %2169 = vmatpush1.bf16.msra.mxu1 %v2421_v15 }
 0x647   :  { %2139 = vmatprep.subr.bf16.mxu0 %v2425_v19  ;;  %2171 = vmatprep.subr.bf16.mxu1 %v2427_v20 }
 0x648   :  { %1520 = vmatprep.mubr.f32.mxu0 %v2360_v1  ;;  %1591 = vmatprep.mubr.f32.mxu1 %v2360_v1  ;;  %v1261_v1 = vpop.permute.xlu0 %1260 }
 0x649   :  { %v1263_v11 = vmul.f32 %v1261_v1, %v2563_v63  ;;  %v1264_v15 = vmul.f32 %v1261_v1, %v2568_v5  ;;  %v1455_v63 = vadd.f32 %v1451_v26, %v2581_v32  ;;  %v1450_v5 = vmul.f32 %v1446_v10, %v2583_v35 }
 0x64a   :  { %2141 = vmatpush1.bf16.msra.mxu0 %v2430_v24  ;;  %2173 = vmatpush1.bf16.msra.mxu1 %v2434_v28 }
 0x64b   :  { %2143 = vmatprep.subr.bf16.mxu0 %v2436_v29  ;;  %2175 = vmatprep.subr.bf16.mxu1 %v2438_v33  ;;  %v1267_v19 = vadd.f32 %v1263_v11, %v2571_v13  ;;  %v1268_v28 = vadd.f32 %v1264_v15, %v2574_v16  ;;  %v1454_v13 = vadd.f32 %v1450_v5, %v2587_v57 }
 0x64e   :  { %2145 = vmatpush1.bf16.msra.mxu0 %v2441_v37  ;;  %2177 = vmatpush1.bf16.msra.mxu1 %v2445_v41 }
 0x64f   :  { %2147 = vmatprep.subr.bf16.mxu0 %v2447_v42  ;;  %2179 = vmatprep.subr.bf16.mxu1 %v2450_v46  ;;  %v1266_v42 = vmul.f32 %v1261_v1, %v2576_v17 }
 0x652   :  { %2149 = vmatpush1.bf16.msra.mxu0 %v2453_v53  ;;  %2181 = vmatpush1.bf16.msra.mxu1 %v2457_v54  ;;  %v1270_v54 = vadd.f32 %v1266_v42, %v2581_v32 }
 0x653   :  { %2151 = vmatprep.subr.bf16.mxu0 %v2459_v55  ;;  %2183 = vmatprep.subr.bf16.mxu1 %v2462_v59  ;;  %v1265_v55 = vmul.f32 %v1261_v1, %v2583_v35 }
 0x656   :  { %2153 = vmatpush1.bf16.msra.mxu0 %v2465_v2  ;;  %2185 = vmatpush1.bf16.msra.mxu1 %v2469_v3  ;;  %v1269_v2 = vadd.f32 %v1265_v55, %v2587_v57 }
 0x657   :  { %2155 = vmatprep.subr.bf16.mxu0 %v2471_v4  ;;  %2187 = vmatprep.subr.bf16.mxu1 %v2474_v9 }
 0x65a   :  { %2157 = vmatpush1.bf16.msra.mxu0 %v2477_v18  ;;  %2189 = vmatpush1.bf16.msra.mxu1 %v2481_v22 }
 0x65b   :  { %2159 = vmatprep.subr.bf16.mxu0 %v2483_v23  ;;  %2191 = vmatprep.subr.bf16.mxu1 %v2489_v30 }
 0x65e   :  { %2161 = vmatpush1.bf16.msra.mxu0 %v2495_v39  ;;  %2193 = vmatpush1.bf16.msra.mxu1 %v2499_v40 }
 0x65f   :  { %2163 = vmatprep.subr.bf16.mxu0 %v2501_v43  ;;  %2195 = vmatprep.subr.bf16.mxu1 %v2504_v47 }
 0x662   :  { %2165 = vmatpush1.bf16.msra.mxu0 %v2510_v51  ;;  %2197 = vmatpush1.bf16.msra.mxu1 %v2514_v52 }
 0x718   :  { %v1337_v20 = vpop.f32.mrb[12].mxu0  ;;  %v1408_v24 = vpop.f32.mrb[12].mxu1 }
 0x719   :  { %v1413_v29 = vadd.f32 %v1337_v20, %v1267_v19  ;;  %v1339_v33 = vpop.f32.mrb[13].mxu0  ;;  %v1410_v37 = vpop.f32.mrb[13].mxu1  ;;  %v1415_v4 = vadd.f32 %v1408_v24, %v1269_v2  ;;  %v1684_v24 = vld [vmem:[%s2894_s4] ss:$0 sm:$0xff] }
 0x71a   :  { %v1414_v41 = vadd.f32 %v1339_v33, %v1268_v28  ;;  %v1416_v59 = vadd.f32 %v1410_v37, %v1270_v54  ;;  %v1685_v37 = vld [vmem:[#allocation2] ss:$0 sm:$0xff] }
 0x71b   :  { %v1677_v46 = vmul.f32 -1.442695, %v1413_v29 }
 0x71c   :  { %v1678_v53 = vmul.f32 -1.442695, %v1414_v41  ;;  %v1679_v3 = vmul.f32 -1.442695, %v1416_v59 }
 0x71d   :  { %2301 = vpow2.f32 %v1677_v46 }
 0x71e   :  { %2303 = vpow2.f32 %v1678_v53 }
 0x71f   :  { %2305 = vpow2.f32 %v1679_v3 }
 0x720   :  { %2307 = vtanh.f32 %v1415_v4 }
 0x727   :  { %v2302_v9 = vpop.eup %2301 }
 0x728   :  { %v2304_v18 = vpop.eup %2303  ;;  %v1420_v22 = vadd.f32 1.0, %v2302_v9 }
 0x729   :  { %v1426_v23 = vadd.f32 1.0, %v2304_v18  ;;  %v2306_v30 = vpop.eup %2305 }
 0x72a   :  { %2309 = vrcp.f32 %v1420_v22  ;;  %v2308_v39 = vpop.eup %2307  ;;  %v1433_v51 = vadd.f32 1.0, %v2306_v30 }
 0x72b   :  { %2311 = vrcp.f32 %v1426_v23 }
 0x72c   :  { %2313 = vrcp.f32 %v1433_v51 }
 0x734   :  { %v2310_v40 = vpop.eup %2309 }
 0x735   :  { %v2312_v43 = vpop.eup %2311  ;;  %v1437_v47 = vmul.f32 %v2310_v40, %v2308_v39 }
 0x736   :  { %v1436_v52 = vmul.f32 %v2312_v43, %v2832_v34  ;;  %v2314_v45 = vpop.eup %2313 }
 0x738   :  { %v1438_v61 = vadd.f32 %v1437_v47, %v1436_v52 }
 0x73a   :  { %2315 = vtanh.f32 %v1438_v61 }
 0x744   :  { %v2316_v6 = vpop.eup %2315 }
 0x745   :  { %v1440_v49 = vmul.f32 %v2316_v6, %v2314_v45 }
 0x747   :  { %1521 = vmatmul.mubr.f32.vlgmr.msra.gmra.mrb[14].mxu0 %v1440_v49  ;;  %1592 = vmatmul.mubr.f32.vlgmr.msra.gmra.mrb[14].mxu1 %v1440_v49 }
 0x81a   :  { %v1522_v62 = vpop.f32.mrb[14].mxu0  ;;  %v1593_v8 = vpop.f32.mrb[14].mxu1 }
 0x81b   :  { %v1598_v38 = vadd.f32 %v1522_v62, %v1452_v48  ;;  %v1524_v14 = vpop.f32.mrb[15].mxu0  ;;  %v1595_v21 = vpop.f32.mrb[15].mxu1  ;;  %v1600_v0 = vadd.f32 %v1593_v8, %v1454_v13 }
 0x81c   :  { %v1599_v58 = vadd.f32 %v1524_v14, %v1453_v60  ;;  %v1601_v27 = vadd.f32 %v1595_v21, %v1455_v63 }
 0x81d   :  { %v1681_v12 = vmul.f32 -1.442695, %v1598_v38 }
 0x81e   :  { %v1682_v7 = vmul.f32 -1.442695, %v1599_v58  ;;  %v1683_v31 = vmul.f32 -1.442695, %v1601_v27 }
 0x81f   :  { %2317 = vpow2.f32 %v1681_v12 }
 0x820   :  { %2319 = vpow2.f32 %v1682_v7 }
 0x821   :  { %2321 = vpow2.f32 %v1683_v31 }
 0x822   :  { %2323 = vtanh.f32 %v1600_v0 }
 0x829   :  { %v2318_v16 = vpop.eup %2317 }
 0x82a   :  { %v2320_v34 = vpop.eup %2319  ;;  %v1605_v25 = vadd.f32 1.0, %v2318_v16 }
 0x82b   :  { %v1611_v17 = vadd.f32 1.0, %v2320_v34  ;;  %v2322_v36 = vpop.eup %2321 }
 0x82c   :  { %2325 = vrcp.f32 %v1605_v25  ;;  %v2324_v44 = vpop.eup %2323  ;;  %v1618_v15 = vadd.f32 1.0, %v2322_v36 }
 0x82d   :  { %2327 = vrcp.f32 %v1611_v17 }
 0x82e   :  { %2329 = vrcp.f32 %v1618_v15 }
 0x836   :  { %v2326_v1 = vpop.eup %2325 }
 0x837   :  { %v2328_v11 = vpop.eup %2327  ;;  %v1622_v32 = vmul.f32 %v2326_v1, %v2324_v44 }
 0x838   :  { %v1621_v35 = vmul.f32 %v2328_v11, %v1438_v61  ;;  %v2330_v57 = vpop.eup %2329 }
 0x83a   :  { %v1623_v19 = vadd.f32 %v1622_v32, %v1621_v35 }
 0x83c   :  { %2331 = vtanh.f32 %v1623_v19 }
 0x846   :  { %v2332_v20 = vpop.eup %2331 }
 0x847   :  { %v1625_v28 = vmul.f32 %v2332_v20, %v2330_v57 }
 0x849   :  { %v1633_v29 = vmul.f32 %v1684_v24, %v1625_v28 }
 0x84b   :  { %v1635_v33 = vsel %vm1634_vm0, %v1633_v29, 0.0 }
 0x84c   :  { %1636 = vadd.xlane.f32.xlu0 %v1635_v33 }
 0x8d9   :  { %v1637_v41 = vpop.xlane.xlu0 %1636 }
 0x8da   :  { %v1645_v42 = vadd.f32 %v1685_v37, %v1637_v41 }
 0x8dc   :  { %1647 = vst.msk [vmem:[%s2896_s6] sm:$0x3] %vm1646_vm1, %v1645_v42 }
 0x8dd   :  { %1652 = vsyncpa [#allocation4], 1 }

</bundles_post_ra>
